<compile_context>
chip_gen: v6e
topology: v6e:2x2x1
jax: 0.10.0
libtpu: 0.0.40
codegen_flags: <defaults>
</compile_context>

<pallas_src>
import numpy as np
import jax
import jax.numpy as jnp
from jax.experimental import pallas as pl
from jax.experimental.pallas import tpu as pltpu

SQRT_2 = float(np.sqrt(2.0))
GELU_TANH_C = 0.7978845608028654     # sqrt(2/pi)


def _gelu_tanh(x):
    # tanh-form GELU: a single EUP tanh instead of exp + exact divide + abs/select.
    return 0.5 * x * (1.0 + jnp.tanh(GELU_TANH_C * (x + 0.044715 * x * x * x)))


def _sigmoid(x):
    # approx reciprocal goes to the EUP slot; error is purely relative on the gate.
    return pl.reciprocal(1.0 + jnp.exp(-x), approx=True)


def make_ssb_kernel(k_time, inv_t_out):
    def ssb_kernel(x_ref, w_ref, b_ref, w1_ref, w2_ref, pool_ref, o_ref):
        # x_ref:    (1, n_ch, Lx)          bf16  packed padded raw signal tile
        # w_ref:    (k_time, out_ch, n_ch) bf16  BN-folded conv weight, per tap
        # b_ref:    (out_ch, 1)            f32   BN-folded bias
        # w1_ref:   (out_ch//4, out_ch)    f32   SE squeeze weight
        # w2_ref:   (out_ch, out_ch//4)    f32   SE excite weight
        # pool_ref: (L, b_tile)            bf16  0/1 column -> sample mask
        # o_ref:    (1, out_ch, b_tile)    f32   pooled, gated output
        L = pool_ref.shape[0]
        x = x_ref[0]                                               # (n_ch, Lx)

        # Conv + folded BN: k_time lane-shifted matmuls accumulated in f32.
        # Packed column j = b_local*t_pad + t, so x[:, k:k+L][c, j] == x_pad[b, c, t+k].
        acc = jnp.dot(w_ref[0], x[:, 0:L], preferred_element_type=jnp.float32)
        for k in range(1, k_time):
            acc = acc + jnp.dot(w_ref[k], x[:, k:k + L],
                                preferred_element_type=jnp.float32)
        y = _gelu_tanh(acc + b_ref[...])                           # (out_ch, L) f32

        # TODO(synk): DropBlock2D is a stochastic training-time regularizer; it is
        # an identity at inference, so it is not implemented here.

        # Per-sample time mean: 0/1-mask matmul (masks per-sample shift slack,
        # lane padding and batch padding), exact f32 1/t_out applied afterwards.
        s = jnp.dot(y.astype(pool_ref.dtype), pool_ref[...],
                    preferred_element_type=jnp.float32) * inv_t_out   # (out_ch, b_tile)

        # Squeeze-and-Excitation gate (1x1 convs == channel matmuls, N = b_tile).
        z = _gelu_tanh(jnp.dot(w1_ref[...], s, preferred_element_type=jnp.float32))
        z = jnp.dot(w2_ref[...], z, preferred_element_type=jnp.float32)

        # Gate is constant over time => pooled(y * gate) == gate * pooled(y).
        o_ref[0] = (s * _sigmoid(z)).astype(o_ref.dtype)

    return ssb_kernel


def spatial_spectral_block(x, params, *, k_time=20, eps=1e-5, b_tile=None):
    """x: (B, 1, n_ch, T) NCHW float32.  Returns (B, n_ch, out_ch).  Eval mode."""
    B, cin, n_ch, T = x.shape
    assert cin == 1
    w = params["conv_w"].astype(jnp.float32)              # (out_ch, n_ch, k_time)
    out_ch = w.shape[0]
    pad = k_time // 2
    t_out = T + 2 * pad - k_time + 1                       # true conv output length
    t_pad = T + 2 * pad                                    # per-sample packed lane stride
    nk = n_ch * k_time

    # Batch tile: keep the per-step VMEM working set (f32 conv/GELU map + bf16
    # shifted slice + double-buffered bf16 input, per packed column) around
    # ~6 MiB -- inside every generation's scoped VMEM (incl. v7x's 32 MiB) --
    # while forcing >= 3 grid steps whenever B permits so the DMA pipeline
    # overlaps compute and v7x's second TensorCore gets work on the "parallel"
    # batch axis (>= 2 steps for B == 2).
    if b_tile is None:
        bytes_per_col = 4 * out_ch + 2 * nk + 4 * n_ch
        b_vmem = max(1, (6 << 20) // (bytes_per_col * t_pad))
        b_grid = max(1, B // 3)
        b_tile = max(1, min(B, 64, b_vmem, b_grid))
    num_tiles = -(-B // b_tile)
    b_padn = num_tiles * b_tile

    L = -(-(b_tile * t_pad) // 128) * 128                  # matmul lane extent (128-aligned)
    Lx = -(-(L + k_time - 1) // 128) * 128                 # signal lane extent (room for k shifts)

    # ---- packed raw signal (NOT im2col): (num_tiles, n_ch, Lx) bf16, column j = b*t_pad + t.
    xp = jnp.pad(x[:, 0].astype(jnp.float32),
                 ((0, b_padn - B), (0, 0), (pad, pad)))                        # (b_padn, n_ch, t_pad)
    xp = jnp.transpose(xp.reshape(num_tiles, b_tile, n_ch, t_pad), (0, 2, 1, 3))
    xp = xp.reshape(num_tiles, n_ch, b_tile * t_pad)
    xp = jnp.pad(xp, ((0, 0), (0, 0), (0, Lx - b_tile * t_pad))).astype(jnp.bfloat16)

    # ---- fold BatchNorm (eval) into the conv weight + one bias column.
    gamma = params["bn_gamma"].astype(jnp.float32)
    beta = params["bn_beta"].astype(jnp.float32)
    mean = params["bn_mean"].astype(jnp.float32)
    var = params["bn_var"].astype(jnp.float32)
    scale = gamma / jnp.sqrt(var + eps)
    wk = jnp.transpose(w * scale[:, None, None], (2, 0, 1)).astype(jnp.bfloat16)  # (k_time, out_ch, n_ch)
    bias = (beta - mean * scale).reshape(out_ch, 1)                               # (out_ch, 1) f32

    w1 = params["se_w1"].astype(jnp.float32)               # (out_ch//4, out_ch)
    w2 = params["se_w2"].astype(jnp.float32)               # (out_ch, out_ch//4)

    # 0/1 pooling mask: column b*t_pad + t -> sample b for t < t_out; the per-sample
    # shift slack (t >= t_out), lane padding and batch padding rows stay zero.
    pm = np.zeros((L, b_tile), np.float32)
    for b in range(b_tile):
        pm[b * t_pad: b * t_pad + t_out, b] = 1.0
    pool_mask = jnp.asarray(pm, dtype=jnp.bfloat16)

    kernel = make_ssb_kernel(k_time, 1.0 / t_out)

    def full(shape):
        return pl.BlockSpec(shape, lambda i, _r=len(shape): (0,) * _r)

    out = pl.pallas_call(
        kernel,
        out_shape=jax.ShapeDtypeStruct((num_tiles, out_ch, b_tile), jnp.float32),
        grid=(num_tiles,),
        in_specs=[
            pl.BlockSpec((1, n_ch, Lx), lambda i: (i, 0, 0)),   # packed signal tile
            full((k_time, out_ch, n_ch)),                        # folded conv weight (per tap)
            full((out_ch, 1)),                                   # folded BN bias
            full((out_ch // 4, out_ch)),                         # SE w1
            full((out_ch, out_ch // 4)),                         # SE w2
            full((L, b_tile)),                                   # pooling mask
        ],
        out_specs=pl.BlockSpec((1, out_ch, b_tile), lambda i: (i, 0, 0)),
        compiler_params=pltpu.CompilerParams(
            dimension_semantics=("parallel",),
            vmem_limit_bytes=32 << 20),
    )(xp, wk, bias, w1, w2, pool_mask)

    p = jnp.transpose(out, (0, 2, 1)).reshape(b_padn, out_ch)[:B]       # (B, out_ch)
    # AdaptiveAvgPool2d((n_ch, 1)) with H_in == 1 replicates over n_ch; then
    # `.squeeze(-1).permute(0, 2, 1)` -> (B, n_ch, out_ch).
    return jnp.broadcast_to(p[:, None, :], (B, n_ch, out_ch))


def reference(x, params, *, k_time=20, eps=1e-5):
    """Pure-JAX reference of the PyTorch forward (eval mode, exact-erf GELU)."""
    B, _, n_ch, T = x.shape
    w = params["conv_w"].astype(jnp.float32)
    out_ch = w.shape[0]
    pad = k_time // 2
    xp = jnp.pad(x[:, 0].astype(jnp.float32), ((0, 0), (0, 0), (pad, pad)))
    t_out = T + 2 * pad - k_time + 1
    patches = jnp.stack([xp[:, :, k:k + t_out] for k in range(k_time)], axis=-1)  # (B,n_ch,t_out,k)
    y = jnp.einsum('bctk,ock->bot', patches, w)                                   # (B,out_ch,t_out)
    g = params["bn_gamma"][None, :, None]
    be = params["bn_beta"][None, :, None]
    mu = params["bn_mean"][None, :, None]
    va = params["bn_var"][None, :, None]
    y = (y - mu) / jnp.sqrt(va + eps) * g + be
    y = 0.5 * y * (1.0 + jax.lax.erf(y / SQRT_2))
    s = jnp.mean(y, axis=-1)                                                      # (B, out_ch)
    z = jnp.einsum('jo,bo->bj', params["se_w1"], s)
    z = 0.5 * z * (1.0 + jax.lax.erf(z / SQRT_2))
    z = jnp.einsum('oj,bj->bo', params["se_w2"], z)
    y = y * jax.nn.sigmoid(z)[:, :, None]
    p = jnp.mean(y, axis=-1)                                                      # (B, out_ch)
    return jnp.broadcast_to(p[:, None, :], (B, n_ch, out_ch))


if __name__ == "__main__":
    B, n_ch, T = 2, 4, 16
    out_ch, k_time = 32, 20

    key = jax.random.PRNGKey(0)
    ks = jax.random.split(key, 8)
    params = {
        "conv_w":  0.1 * jax.random.normal(ks[0], (out_ch, n_ch, k_time), jnp.float32),
        "bn_gamma": 1.0 + 0.1 * jax.random.normal(ks[1], (out_ch,), jnp.float32),
        "bn_beta":  0.1 * jax.random.normal(ks[2], (out_ch,), jnp.float32),
        "bn_mean":  0.1 * jax.random.normal(ks[3], (out_ch,), jnp.float32),
        "bn_var":   1.0 + 0.1 * jax.random.uniform(ks[4], (out_ch,), jnp.float32),
        "se_w1":    0.3 * jax.random.normal(ks[5], (out_ch // 4, out_ch), jnp.float32),
        "se_w2":    0.3 * jax.random.normal(ks[6], (out_ch, out_ch // 4), jnp.float32),
    }
    x = jax.random.normal(ks[7], (B, 1, n_ch, T), jnp.float32)

    out = spatial_spectral_block(x, params, k_time=k_time)
    out = jax.block_until_ready(out)
    assert out.shape == (B, n_ch, out_ch), out.shape

    ref = reference(x, params, k_time=k_time)
    err = float(jnp.max(jnp.abs(out - ref)))
    # bf16 conv operands (~1e-3 worst case) + tanh-GELU (~5e-4) + approx sigmoid
    # reciprocal; measured error is well inside 3e-3.
    assert jnp.allclose(out, ref, rtol=3e-3, atol=3e-3), f"max abs err = {err}"

    print("KERNEL_OK")
</pallas_src>

<mosaic_0001>
module attributes {stable_mosaic.version = 11 : i64} {
  func.func @ssb_kernel(%arg0: i32, %arg1: memref<1x4x256xbf16, #tpu.memory_space<vmem>>, %arg2: memref<20x32x4xbf16, #tpu.memory_space<vmem>>, %arg3: memref<32x1xf32, #tpu.memory_space<vmem>>, %arg4: memref<8x32xf32, #tpu.memory_space<vmem>>, %arg5: memref<32x8xf32, #tpu.memory_space<vmem>>, %arg6: memref<128x1xbf16, #tpu.memory_space<vmem>>, %arg7: memref<1x32x1xf32, #tpu.memory_space<vmem>>) attributes {dimension_semantics = [#tpu.dimension_semantics<parallel>], iteration_bounds = array<i64: 2>, scalar_prefetch = 0 : i64, scratch_operands = 0 : i64, tpu.core_type = #tpu.core_type<tc>, window_params = [{transform_indices = @transform_0, window_bounds = array<i64: 1, 4, 256>}, {pipeline_mode = #tpu.pipeline_mode<synchronous>, transform_indices = @transform_1, window_bounds = array<i64: 20, 32, 4>}, {pipeline_mode = #tpu.pipeline_mode<synchronous>, transform_indices = @transform_2, window_bounds = array<i64: 32, 1>}, {pipeline_mode = #tpu.pipeline_mode<synchronous>, transform_indices = @transform_3, window_bounds = array<i64: 8, 32>}, {pipeline_mode = #tpu.pipeline_mode<synchronous>, transform_indices = @transform_4, window_bounds = array<i64: 32, 8>}, {pipeline_mode = #tpu.pipeline_mode<synchronous>, transform_indices = @transform_5, window_bounds = array<i64: 128, 1>}, {transform_indices = @transform_6, window_bounds = array<i64: 1, 32, 1>}]} {
    %c0 = arith.constant 0 : index
    %c0_0 = arith.constant 0 : index
    %c0_1 = arith.constant 0 : index
    %0 = vector.load %arg1[%c0, %c0_0, %c0_1] : memref<1x4x256xbf16, #tpu.memory_space<vmem>>, vector<1x4x256xbf16>
    %1 = vector.shape_cast %0 : vector<1x4x256xbf16> to vector<4x256xbf16>
    %c0_2 = arith.constant 0 : index
    %c0_3 = arith.constant 0 : index
    %c0_4 = arith.constant 0 : index
    %2 = vector.load %arg2[%c0_2, %c0_3, %c0_4] : memref<20x32x4xbf16, #tpu.memory_space<vmem>>, vector<1x32x4xbf16>
    %3 = vector.shape_cast %2 : vector<1x32x4xbf16> to vector<32x4xbf16>
    %4 = vector.extract_strided_slice %1 {offsets = [0, 0], sizes = [4, 128], strides = [1, 1]} : vector<4x256xbf16> to vector<4x128xbf16>
    %cst = arith.constant dense<0.000000e+00> : vector<32x128xf32>
    %5 = tpu.matmul %3, %4, %cst {dimension_numbers = #tpu.dot_dimension_numbers<[1], [0], [0], [1], [0, 0, 1, 1], [], []>} : vector<32x4xbf16>, vector<4x128xbf16>, vector<32x128xf32> -> vector<32x128xf32>
    %c1 = arith.constant 1 : index
    %c0_5 = arith.constant 0 : index
    %c0_6 = arith.constant 0 : index
    %6 = vector.load %arg2[%c1, %c0_5, %c0_6] : memref<20x32x4xbf16, #tpu.memory_space<vmem>>, vector<1x32x4xbf16>
    %7 = vector.shape_cast %6 : vector<1x32x4xbf16> to vector<32x4xbf16>
    %8 = vector.extract_strided_slice %1 {offsets = [0, 1], sizes = [4, 128], strides = [1, 1]} : vector<4x256xbf16> to vector<4x128xbf16>
    %cst_7 = arith.constant dense<0.000000e+00> : vector<32x128xf32>
    %9 = tpu.matmul %7, %8, %cst_7 {dimension_numbers = #tpu.dot_dimension_numbers<[1], [0], [0], [1], [0, 0, 1, 1], [], []>} : vector<32x4xbf16>, vector<4x128xbf16>, vector<32x128xf32> -> vector<32x128xf32>
    %10 = arith.addf %5, %9 : vector<32x128xf32>
    %c2 = arith.constant 2 : index
    %c0_8 = arith.constant 0 : index
    %c0_9 = arith.constant 0 : index
    %11 = vector.load %arg2[%c2, %c0_8, %c0_9] : memref<20x32x4xbf16, #tpu.memory_space<vmem>>, vector<1x32x4xbf16>
    %12 = vector.shape_cast %11 : vector<1x32x4xbf16> to vector<32x4xbf16>
    %13 = vector.extract_strided_slice %1 {offsets = [0, 2], sizes = [4, 128], strides = [1, 1]} : vector<4x256xbf16> to vector<4x128xbf16>
    %cst_10 = arith.constant dense<0.000000e+00> : vector<32x128xf32>
    %14 = tpu.matmul %12, %13, %cst_10 {dimension_numbers = #tpu.dot_dimension_numbers<[1], [0], [0], [1], [0, 0, 1, 1], [], []>} : vector<32x4xbf16>, vector<4x128xbf16>, vector<32x128xf32> -> vector<32x128xf32>
    %15 = arith.addf %10, %14 : vector<32x128xf32>
    %c3 = arith.constant 3 : index
    %c0_11 = arith.constant 0 : index
    %c0_12 = arith.constant 0 : index
    %16 = vector.load %arg2[%c3, %c0_11, %c0_12] : memref<20x32x4xbf16, #tpu.memory_space<vmem>>, vector<1x32x4xbf16>
    %17 = vector.shape_cast %16 : vector<1x32x4xbf16> to vector<32x4xbf16>
    %18 = vector.extract_strided_slice %1 {offsets = [0, 3], sizes = [4, 128], strides = [1, 1]} : vector<4x256xbf16> to vector<4x128xbf16>
    %cst_13 = arith.constant dense<0.000000e+00> : vector<32x128xf32>
    %19 = tpu.matmul %17, %18, %cst_13 {dimension_numbers = #tpu.dot_dimension_numbers<[1], [0], [0], [1], [0, 0, 1, 1], [], []>} : vector<32x4xbf16>, vector<4x128xbf16>, vector<32x128xf32> -> vector<32x128xf32>
    %20 = arith.addf %15, %19 : vector<32x128xf32>
    %c4 = arith.constant 4 : index
    %c0_14 = arith.constant 0 : index
    %c0_15 = arith.constant 0 : index
    %21 = vector.load %arg2[%c4, %c0_14, %c0_15] : memref<20x32x4xbf16, #tpu.memory_space<vmem>>, vector<1x32x4xbf16>
    %22 = vector.shape_cast %21 : vector<1x32x4xbf16> to vector<32x4xbf16>
    %23 = vector.extract_strided_slice %1 {offsets = [0, 4], sizes = [4, 128], strides = [1, 1]} : vector<4x256xbf16> to vector<4x128xbf16>
    %cst_16 = arith.constant dense<0.000000e+00> : vector<32x128xf32>
    %24 = tpu.matmul %22, %23, %cst_16 {dimension_numbers = #tpu.dot_dimension_numbers<[1], [0], [0], [1], [0, 0, 1, 1], [], []>} : vector<32x4xbf16>, vector<4x128xbf16>, vector<32x128xf32> -> vector<32x128xf32>
    %25 = arith.addf %20, %24 : vector<32x128xf32>
    %c5 = arith.constant 5 : index
    %c0_17 = arith.constant 0 : index
    %c0_18 = arith.constant 0 : index
    %26 = vector.load %arg2[%c5, %c0_17, %c0_18] : memref<20x32x4xbf16, #tpu.memory_space<vmem>>, vector<1x32x4xbf16>
    %27 = vector.shape_cast %26 : vector<1x32x4xbf16> to vector<32x4xbf16>
    %28 = vector.extract_strided_slice %1 {offsets = [0, 5], sizes = [4, 128], strides = [1, 1]} : vector<4x256xbf16> to vector<4x128xbf16>
    %cst_19 = arith.constant dense<0.000000e+00> : vector<32x128xf32>
    %29 = tpu.matmul %27, %28, %cst_19 {dimension_numbers = #tpu.dot_dimension_numbers<[1], [0], [0], [1], [0, 0, 1, 1], [], []>} : vector<32x4xbf16>, vector<4x128xbf16>, vector<32x128xf32> -> vector<32x128xf32>
    %30 = arith.addf %25, %29 : vector<32x128xf32>
    %c6 = arith.constant 6 : index
    %c0_20 = arith.constant 0 : index
    %c0_21 = arith.constant 0 : index
    %31 = vector.load %arg2[%c6, %c0_20, %c0_21] : memref<20x32x4xbf16, #tpu.memory_space<vmem>>, vector<1x32x4xbf16>
    %32 = vector.shape_cast %31 : vector<1x32x4xbf16> to vector<32x4xbf16>
    %33 = vector.extract_strided_slice %1 {offsets = [0, 6], sizes = [4, 128], strides = [1, 1]} : vector<4x256xbf16> to vector<4x128xbf16>
    %cst_22 = arith.constant dense<0.000000e+00> : vector<32x128xf32>
    %34 = tpu.matmul %32, %33, %cst_22 {dimension_numbers = #tpu.dot_dimension_numbers<[1], [0], [0], [1], [0, 0, 1, 1], [], []>} : vector<32x4xbf16>, vector<4x128xbf16>, vector<32x128xf32> -> vector<32x128xf32>
    %35 = arith.addf %30, %34 : vector<32x128xf32>
    %c7 = arith.constant 7 : index
    %c0_23 = arith.constant 0 : index
    %c0_24 = arith.constant 0 : index
    %36 = vector.load %arg2[%c7, %c0_23, %c0_24] : memref<20x32x4xbf16, #tpu.memory_space<vmem>>, vector<1x32x4xbf16>
    %37 = vector.shape_cast %36 : vector<1x32x4xbf16> to vector<32x4xbf16>
    %38 = vector.extract_strided_slice %1 {offsets = [0, 7], sizes = [4, 128], strides = [1, 1]} : vector<4x256xbf16> to vector<4x128xbf16>
    %cst_25 = arith.constant dense<0.000000e+00> : vector<32x128xf32>
    %39 = tpu.matmul %37, %38, %cst_25 {dimension_numbers = #tpu.dot_dimension_numbers<[1], [0], [0], [1], [0, 0, 1, 1], [], []>} : vector<32x4xbf16>, vector<4x128xbf16>, vector<32x128xf32> -> vector<32x128xf32>
    %40 = arith.addf %35, %39 : vector<32x128xf32>
    %c8 = arith.constant 8 : index
    %c0_26 = arith.constant 0 : index
    %c0_27 = arith.constant 0 : index
    %41 = vector.load %arg2[%c8, %c0_26, %c0_27] : memref<20x32x4xbf16, #tpu.memory_space<vmem>>, vector<1x32x4xbf16>
    %42 = vector.shape_cast %41 : vector<1x32x4xbf16> to vector<32x4xbf16>
    %43 = vector.extract_strided_slice %1 {offsets = [0, 8], sizes = [4, 128], strides = [1, 1]} : vector<4x256xbf16> to vector<4x128xbf16>
    %cst_28 = arith.constant dense<0.000000e+00> : vector<32x128xf32>
    %44 = tpu.matmul %42, %43, %cst_28 {dimension_numbers = #tpu.dot_dimension_numbers<[1], [0], [0], [1], [0, 0, 1, 1], [], []>} : vector<32x4xbf16>, vector<4x128xbf16>, vector<32x128xf32> -> vector<32x128xf32>
    %45 = arith.addf %40, %44 : vector<32x128xf32>
    %c9 = arith.constant 9 : index
    %c0_29 = arith.constant 0 : index
    %c0_30 = arith.constant 0 : index
    %46 = vector.load %arg2[%c9, %c0_29, %c0_30] : memref<20x32x4xbf16, #tpu.memory_space<vmem>>, vector<1x32x4xbf16>
    %47 = vector.shape_cast %46 : vector<1x32x4xbf16> to vector<32x4xbf16>
    %48 = vector.extract_strided_slice %1 {offsets = [0, 9], sizes = [4, 128], strides = [1, 1]} : vector<4x256xbf16> to vector<4x128xbf16>
    %cst_31 = arith.constant dense<0.000000e+00> : vector<32x128xf32>
    %49 = tpu.matmul %47, %48, %cst_31 {dimension_numbers = #tpu.dot_dimension_numbers<[1], [0], [0], [1], [0, 0, 1, 1], [], []>} : vector<32x4xbf16>, vector<4x128xbf16>, vector<32x128xf32> -> vector<32x128xf32>
    %50 = arith.addf %45, %49 : vector<32x128xf32>
    %c10 = arith.constant 10 : index
    %c0_32 = arith.constant 0 : index
    %c0_33 = arith.constant 0 : index
    %51 = vector.load %arg2[%c10, %c0_32, %c0_33] : memref<20x32x4xbf16, #tpu.memory_space<vmem>>, vector<1x32x4xbf16>
    %52 = vector.shape_cast %51 : vector<1x32x4xbf16> to vector<32x4xbf16>
    %53 = vector.extract_strided_slice %1 {offsets = [0, 10], sizes = [4, 128], strides = [1, 1]} : vector<4x256xbf16> to vector<4x128xbf16>
    %cst_34 = arith.constant dense<0.000000e+00> : vector<32x128xf32>
    %54 = tpu.matmul %52, %53, %cst_34 {dimension_numbers = #tpu.dot_dimension_numbers<[1], [0], [0], [1], [0, 0, 1, 1], [], []>} : vector<32x4xbf16>, vector<4x128xbf16>, vector<32x128xf32> -> vector<32x128xf32>
    %55 = arith.addf %50, %54 : vector<32x128xf32>
    %c11 = arith.constant 11 : index
    %c0_35 = arith.constant 0 : index
    %c0_36 = arith.constant 0 : index
    %56 = vector.load %arg2[%c11, %c0_35, %c0_36] : memref<20x32x4xbf16, #tpu.memory_space<vmem>>, vector<1x32x4xbf16>
    %57 = vector.shape_cast %56 : vector<1x32x4xbf16> to vector<32x4xbf16>
    %58 = vector.extract_strided_slice %1 {offsets = [0, 11], sizes = [4, 128], strides = [1, 1]} : vector<4x256xbf16> to vector<4x128xbf16>
    %cst_37 = arith.constant dense<0.000000e+00> : vector<32x128xf32>
    %59 = tpu.matmul %57, %58, %cst_37 {dimension_numbers = #tpu.dot_dimension_numbers<[1], [0], [0], [1], [0, 0, 1, 1], [], []>} : vector<32x4xbf16>, vector<4x128xbf16>, vector<32x128xf32> -> vector<32x128xf32>
    %60 = arith.addf %55, %59 : vector<32x128xf32>
    %c12 = arith.constant 12 : index
    %c0_38 = arith.constant 0 : index
    %c0_39 = arith.constant 0 : index
    %61 = vector.load %arg2[%c12, %c0_38, %c0_39] : memref<20x32x4xbf16, #tpu.memory_space<vmem>>, vector<1x32x4xbf16>
    %62 = vector.shape_cast %61 : vector<1x32x4xbf16> to vector<32x4xbf16>
    %63 = vector.extract_strided_slice %1 {offsets = [0, 12], sizes = [4, 128], strides = [1, 1]} : vector<4x256xbf16> to vector<4x128xbf16>
    %cst_40 = arith.constant dense<0.000000e+00> : vector<32x128xf32>
    %64 = tpu.matmul %62, %63, %cst_40 {dimension_numbers = #tpu.dot_dimension_numbers<[1], [0], [0], [1], [0, 0, 1, 1], [], []>} : vector<32x4xbf16>, vector<4x128xbf16>, vector<32x128xf32> -> vector<32x128xf32>
    %65 = arith.addf %60, %64 : vector<32x128xf32>
    %c13 = arith.constant 13 : index
    %c0_41 = arith.constant 0 : index
    %c0_42 = arith.constant 0 : index
    %66 = vector.load %arg2[%c13, %c0_41, %c0_42] : memref<20x32x4xbf16, #tpu.memory_space<vmem>>, vector<1x32x4xbf16>
    %67 = vector.shape_cast %66 : vector<1x32x4xbf16> to vector<32x4xbf16>
    %68 = vector.extract_strided_slice %1 {offsets = [0, 13], sizes = [4, 128], strides = [1, 1]} : vector<4x256xbf16> to vector<4x128xbf16>
    %cst_43 = arith.constant dense<0.000000e+00> : vector<32x128xf32>
    %69 = tpu.matmul %67, %68, %cst_43 {dimension_numbers = #tpu.dot_dimension_numbers<[1], [0], [0], [1], [0, 0, 1, 1], [], []>} : vector<32x4xbf16>, vector<4x128xbf16>, vector<32x128xf32> -> vector<32x128xf32>
    %70 = arith.addf %65, %69 : vector<32x128xf32>
    %c14 = arith.constant 14 : index
    %c0_44 = arith.constant 0 : index
    %c0_45 = arith.constant 0 : index
    %71 = vector.load %arg2[%c14, %c0_44, %c0_45] : memref<20x32x4xbf16, #tpu.memory_space<vmem>>, vector<1x32x4xbf16>
    %72 = vector.shape_cast %71 : vector<1x32x4xbf16> to vector<32x4xbf16>
    %73 = vector.extract_strided_slice %1 {offsets = [0, 14], sizes = [4, 128], strides = [1, 1]} : vector<4x256xbf16> to vector<4x128xbf16>
    %cst_46 = arith.constant dense<0.000000e+00> : vector<32x128xf32>
    %74 = tpu.matmul %72, %73, %cst_46 {dimension_numbers = #tpu.dot_dimension_numbers<[1], [0], [0], [1], [0, 0, 1, 1], [], []>} : vector<32x4xbf16>, vector<4x128xbf16>, vector<32x128xf32> -> vector<32x128xf32>
    %75 = arith.addf %70, %74 : vector<32x128xf32>
    %c15 = arith.constant 15 : index
    %c0_47 = arith.constant 0 : index
    %c0_48 = arith.constant 0 : index
    %76 = vector.load %arg2[%c15, %c0_47, %c0_48] : memref<20x32x4xbf16, #tpu.memory_space<vmem>>, vector<1x32x4xbf16>
    %77 = vector.shape_cast %76 : vector<1x32x4xbf16> to vector<32x4xbf16>
    %78 = vector.extract_strided_slice %1 {offsets = [0, 15], sizes = [4, 128], strides = [1, 1]} : vector<4x256xbf16> to vector<4x128xbf16>
    %cst_49 = arith.constant dense<0.000000e+00> : vector<32x128xf32>
    %79 = tpu.matmul %77, %78, %cst_49 {dimension_numbers = #tpu.dot_dimension_numbers<[1], [0], [0], [1], [0, 0, 1, 1], [], []>} : vector<32x4xbf16>, vector<4x128xbf16>, vector<32x128xf32> -> vector<32x128xf32>
    %80 = arith.addf %75, %79 : vector<32x128xf32>
    %c16 = arith.constant 16 : index
    %c0_50 = arith.constant 0 : index
    %c0_51 = arith.constant 0 : index
    %81 = vector.load %arg2[%c16, %c0_50, %c0_51] : memref<20x32x4xbf16, #tpu.memory_space<vmem>>, vector<1x32x4xbf16>
    %82 = vector.shape_cast %81 : vector<1x32x4xbf16> to vector<32x4xbf16>
    %83 = vector.extract_strided_slice %1 {offsets = [0, 16], sizes = [4, 128], strides = [1, 1]} : vector<4x256xbf16> to vector<4x128xbf16>
    %cst_52 = arith.constant dense<0.000000e+00> : vector<32x128xf32>
    %84 = tpu.matmul %82, %83, %cst_52 {dimension_numbers = #tpu.dot_dimension_numbers<[1], [0], [0], [1], [0, 0, 1, 1], [], []>} : vector<32x4xbf16>, vector<4x128xbf16>, vector<32x128xf32> -> vector<32x128xf32>
    %85 = arith.addf %80, %84 : vector<32x128xf32>
    %c17 = arith.constant 17 : index
    %c0_53 = arith.constant 0 : index
    %c0_54 = arith.constant 0 : index
    %86 = vector.load %arg2[%c17, %c0_53, %c0_54] : memref<20x32x4xbf16, #tpu.memory_space<vmem>>, vector<1x32x4xbf16>
    %87 = vector.shape_cast %86 : vector<1x32x4xbf16> to vector<32x4xbf16>
    %88 = vector.extract_strided_slice %1 {offsets = [0, 17], sizes = [4, 128], strides = [1, 1]} : vector<4x256xbf16> to vector<4x128xbf16>
    %cst_55 = arith.constant dense<0.000000e+00> : vector<32x128xf32>
    %89 = tpu.matmul %87, %88, %cst_55 {dimension_numbers = #tpu.dot_dimension_numbers<[1], [0], [0], [1], [0, 0, 1, 1], [], []>} : vector<32x4xbf16>, vector<4x128xbf16>, vector<32x128xf32> -> vector<32x128xf32>
    %90 = arith.addf %85, %89 : vector<32x128xf32>
    %c18 = arith.constant 18 : index
    %c0_56 = arith.constant 0 : index
    %c0_57 = arith.constant 0 : index
    %91 = vector.load %arg2[%c18, %c0_56, %c0_57] : memref<20x32x4xbf16, #tpu.memory_space<vmem>>, vector<1x32x4xbf16>
    %92 = vector.shape_cast %91 : vector<1x32x4xbf16> to vector<32x4xbf16>
    %93 = vector.extract_strided_slice %1 {offsets = [0, 18], sizes = [4, 128], strides = [1, 1]} : vector<4x256xbf16> to vector<4x128xbf16>
    %cst_58 = arith.constant dense<0.000000e+00> : vector<32x128xf32>
    %94 = tpu.matmul %92, %93, %cst_58 {dimension_numbers = #tpu.dot_dimension_numbers<[1], [0], [0], [1], [0, 0, 1, 1], [], []>} : vector<32x4xbf16>, vector<4x128xbf16>, vector<32x128xf32> -> vector<32x128xf32>
    %95 = arith.addf %90, %94 : vector<32x128xf32>
    %c19 = arith.constant 19 : index
    %c0_59 = arith.constant 0 : index
    %c0_60 = arith.constant 0 : index
    %96 = vector.load %arg2[%c19, %c0_59, %c0_60] : memref<20x32x4xbf16, #tpu.memory_space<vmem>>, vector<1x32x4xbf16>
    %97 = vector.shape_cast %96 : vector<1x32x4xbf16> to vector<32x4xbf16>
    %98 = vector.extract_strided_slice %1 {offsets = [0, 19], sizes = [4, 128], strides = [1, 1]} : vector<4x256xbf16> to vector<4x128xbf16>
    %cst_61 = arith.constant dense<0.000000e+00> : vector<32x128xf32>
    %99 = tpu.matmul %97, %98, %cst_61 {dimension_numbers = #tpu.dot_dimension_numbers<[1], [0], [0], [1], [0, 0, 1, 1], [], []>} : vector<32x4xbf16>, vector<4x128xbf16>, vector<32x128xf32> -> vector<32x128xf32>
    %100 = arith.addf %95, %99 : vector<32x128xf32>
    %c0_62 = arith.constant 0 : index
    %c0_63 = arith.constant 0 : index
    %101 = vector.load %arg3[%c0_62, %c0_63] : memref<32x1xf32, #tpu.memory_space<vmem>>, vector<32x1xf32>
    %102 = vector.broadcast %101 : vector<32x1xf32> to vector<32x128xf32>
    %103 = arith.addf %100, %102 : vector<32x128xf32>
    %cst_64 = arith.constant 5.000000e-01 : f32
    %104 = vector.broadcast %cst_64 : f32 to vector<32x128xf32>
    %105 = arith.mulf %104, %103 : vector<32x128xf32>
    %cst_65 = arith.constant 4.471500e-02 : f32
    %106 = vector.broadcast %cst_65 : f32 to vector<32x128xf32>
    %107 = arith.mulf %106, %103 : vector<32x128xf32>
    %108 = arith.mulf %107, %103 : vector<32x128xf32>
    %109 = arith.mulf %108, %103 : vector<32x128xf32>
    %110 = arith.addf %103, %109 : vector<32x128xf32>
    %cst_66 = arith.constant 0.797884583 : f32
    %111 = vector.broadcast %cst_66 : f32 to vector<32x128xf32>
    %112 = arith.mulf %111, %110 : vector<32x128xf32>
    %113 = math.tanh %112 : vector<32x128xf32>
    %cst_67 = arith.constant 1.000000e+00 : f32
    %114 = vector.broadcast %cst_67 : f32 to vector<32x128xf32>
    %115 = arith.addf %114, %113 : vector<32x128xf32>
    %116 = arith.mulf %105, %115 : vector<32x128xf32>
    %117 = arith.truncf %116 : vector<32x128xf32> to vector<32x128xbf16>
    %c0_68 = arith.constant 0 : index
    %c0_69 = arith.constant 0 : index
    %118 = vector.load %arg6[%c0_68, %c0_69] : memref<128x1xbf16, #tpu.memory_space<vmem>>, vector<128x1xbf16>
    %cst_70 = arith.constant dense<0.000000e+00> : vector<32x1xf32>
    %119 = tpu.matmul %117, %118, %cst_70 {dimension_numbers = #tpu.dot_dimension_numbers<[1], [0], [0], [1], [0, 0, 1, 1], [], []>} : vector<32x128xbf16>, vector<128x1xbf16>, vector<32x1xf32> -> vector<32x1xf32>
    %cst_71 = arith.constant 0.0588235296 : f32
    %120 = vector.broadcast %cst_71 : f32 to vector<32x1xf32>
    %121 = arith.mulf %119, %120 : vector<32x1xf32>
    %c0_72 = arith.constant 0 : index
    %c0_73 = arith.constant 0 : index
    %122 = vector.load %arg4[%c0_72, %c0_73] : memref<8x32xf32, #tpu.memory_space<vmem>>, vector<8x32xf32>
    %cst_74 = arith.constant dense<0.000000e+00> : vector<8x1xf32>
    %123 = tpu.matmul %122, %121, %cst_74 {dimension_numbers = #tpu.dot_dimension_numbers<[1], [0], [0], [1], [0, 0, 1, 1], [], []>} : vector<8x32xf32>, vector<32x1xf32>, vector<8x1xf32> -> vector<8x1xf32>
    %cst_75 = arith.constant 5.000000e-01 : f32
    %124 = vector.broadcast %cst_75 : f32 to vector<8x1xf32>
    %125 = arith.mulf %124, %123 : vector<8x1xf32>
    %cst_76 = arith.constant 4.471500e-02 : f32
    %126 = vector.broadcast %cst_76 : f32 to vector<8x1xf32>
    %127 = arith.mulf %126, %123 : vector<8x1xf32>
    %128 = arith.mulf %127, %123 : vector<8x1xf32>
    %129 = arith.mulf %128, %123 : vector<8x1xf32>
    %130 = arith.addf %123, %129 : vector<8x1xf32>
    %cst_77 = arith.constant 0.797884583 : f32
    %131 = vector.broadcast %cst_77 : f32 to vector<8x1xf32>
    %132 = arith.mulf %131, %130 : vector<8x1xf32>
    %133 = math.tanh %132 : vector<8x1xf32>
    %cst_78 = arith.constant 1.000000e+00 : f32
    %134 = vector.broadcast %cst_78 : f32 to vector<8x1xf32>
    %135 = arith.addf %134, %133 : vector<8x1xf32>
    %136 = arith.mulf %125, %135 : vector<8x1xf32>
    %c0_79 = arith.constant 0 : index
    %c0_80 = arith.constant 0 : index
    %137 = vector.load %arg5[%c0_79, %c0_80] : memref<32x8xf32, #tpu.memory_space<vmem>>, vector<32x8xf32>
    %cst_81 = arith.constant dense<0.000000e+00> : vector<32x1xf32>
    %138 = tpu.matmul %137, %136, %cst_81 {dimension_numbers = #tpu.dot_dimension_numbers<[1], [0], [0], [1], [0, 0, 1, 1], [], []>} : vector<32x8xf32>, vector<8x1xf32>, vector<32x1xf32> -> vector<32x1xf32>
    %cst_82 = arith.constant 0.000000e+00 : f32
    %139 = vector.broadcast %cst_82 : f32 to vector<32x1xf32>
    %140 = arith.subf %139, %138 : vector<32x1xf32>
    %141 = math.exp %140 : vector<32x1xf32>
    %cst_83 = arith.constant 1.000000e+00 : f32
    %142 = vector.broadcast %cst_83 : f32 to vector<32x1xf32>
    %143 = arith.addf %142, %141 : vector<32x1xf32>
    %144 = tpu.reciprocal %143 {approx = true} : vector<32x1xf32> -> vector<32x1xf32>
    %145 = arith.mulf %121, %144 : vector<32x1xf32>
    %c0_84 = arith.constant 0 : index
    %c0_85 = arith.constant 0 : index
    %c0_86 = arith.constant 0 : index
    %146 = vector.load %arg7[%c0_84, %c0_85, %c0_86] : memref<1x32x1xf32, #tpu.memory_space<vmem>>, vector<1x32x1xf32>
    %147 = vector.shape_cast %146 : vector<1x32x1xf32> to vector<32x1xf32>
    %148 = vector.shape_cast %145 : vector<32x1xf32> to vector<1x32x1xf32>
    tpu.vector_store %arg7[%c0_84, %c0_85, %c0_86], %148 {strides = array<i32>} : memref<1x32x1xf32, #tpu.memory_space<vmem>>, vector<1x32x1xf32>,
    return
  }
  func.func @transform_0(%arg0: i32) -> (i32, i32, i32) {
    %c0_i32 = arith.constant 0 : i32
    %c0_i32_0 = arith.constant 0 : i32
    %c0_i32_1 = arith.constant 0 : i32
    return %arg0, %c0_i32, %c0_i32_0 : i32, i32, i32
  }
  func.func @transform_1(%arg0: i32) -> (i32, i32, i32) {
    %c0_i32 = arith.constant 0 : i32
    %c0_i32_0 = arith.constant 0 : i32
    %c0_i32_1 = arith.constant 0 : i32
    %c0_i32_2 = arith.constant 0 : i32
    return %c0_i32, %c0_i32_0, %c0_i32_1 : i32, i32, i32
  }
  func.func @transform_2(%arg0: i32) -> (i32, i32) {
    %c0_i32 = arith.constant 0 : i32
    %c0_i32_0 = arith.constant 0 : i32
    %c0_i32_1 = arith.constant 0 : i32
    return %c0_i32, %c0_i32_0 : i32, i32
  }
  func.func @transform_3(%arg0: i32) -> (i32, i32) {
    %c0_i32 = arith.constant 0 : i32
    %c0_i32_0 = arith.constant 0 : i32
    %c0_i32_1 = arith.constant 0 : i32
    return %c0_i32, %c0_i32_0 : i32, i32
  }
  func.func @transform_4(%arg0: i32) -> (i32, i32) {
    %c0_i32 = arith.constant 0 : i32
    %c0_i32_0 = arith.constant 0 : i32
    %c0_i32_1 = arith.constant 0 : i32
    return %c0_i32, %c0_i32_0 : i32, i32
  }
  func.func @transform_5(%arg0: i32) -> (i32, i32) {
    %c0_i32 = arith.constant 0 : i32
    %c0_i32_0 = arith.constant 0 : i32
    %c0_i32_1 = arith.constant 0 : i32
    return %c0_i32, %c0_i32_0 : i32, i32
  }
  func.func @transform_6(%arg0: i32) -> (i32, i32, i32) {
    %c0_i32 = arith.constant 0 : i32
    %c0_i32_0 = arith.constant 0 : i32
    %c0_i32_1 = arith.constant 0 : i32
    return %arg0, %c0_i32, %c0_i32_0 : i32, i32, i32
  }
}

</mosaic_0001>

<bundles_post_ra>
// kernel: tpu_custom_call.1
= control target key start
LH: loop header
LB: loop body
LE: loop exit
PB: predicated region body
PF: predicated region fallthrough
CT: control target
= control target key end

     0   :  { %s2977_s21 = smov 0   ;;  %s3274_s0 = inlined_call_operand.vmem [shape: bf16[2,4,256], index: 0, kind: input, shape index: {}]   ;;  %s3275_s1 = inlined_call_operand.vmem [shape: bf16[20,32,4], index: 1, kind: input, shape index: {}]   ;;  %s3276_s2 = inlined_call_operand.vmem [shape: f32[32,1], index: 2, kind: input, shape index: {}]   ;;  %s3277_s3 = inlined_call_operand.vmem [shape: f32[8,32], index: 3, kind: input, shape index: {}]   ;;  %s3278_s4 = inlined_call_operand.vmem [shape: f32[32,8], index: 4, kind: input, shape index: {}]   ;;  %s3279_s5 = inlined_call_operand.vmem [shape: bf16[128,1], index: 5, kind: input, shape index: {}]   ;;  %s3280_s6 = inlined_call_operand.vmem [shape: f32[2,32,1], index: 6, kind: output, shape index: {}]  }
   0x1 LB: > { %s2363_s22 = sadd.s32 4294967295, %s2917_s21   ;;  %p2367_p0 = scmp.ge.s32.totalorder %s2917_s21, 1  ;;  %s2917_s21 = sphi %s2977_s21, %s16_s21  }
   0x2   : > { %p212_p1 = scmp.lt.s32.totalorder %s2917_s21, 3 }
   0x4   : > { %p213_p2 = pnand %p2367_p0, %p212_p1 }
   0x5   : > { %p242_p3 = scmp.lt.s32.totalorder (!%p213_p2), %s2363_s22, 1  ;;  %s2920_s7 = smov (!%p213_p2), 127  }
   0x6   : > { %216 = sbr.rel (%p213_p2) target bundleno = 1123 (0x463), region = 44  ;;  %s2921_s8 = smov (!%p213_p2), 126  }
   0x7   : > { %s2922_s9 = smov (!%p213_p2), 125   ;;  %s2923_s10 = smov (!%p213_p2), 124  }
   0x8   : > { %s2924_s11 = smov (!%p213_p2), 123   ;;  %s2925_s12 = smov (!%p213_p2), 122  }
   0x9   : > { %s2926_s13 = smov (!%p213_p2), 121   ;;  %s2927_s14 = smov (!%p213_p2), 120  }
   0xa   : > { %s2928_s15 = smov (!%p213_p2), 119   ;;  %s2929_s16 = smov (!%p213_p2), 118  }
   0xb   : > { %v277_v0 = vlaneseq  ;;  %v2919_v1 = vmov 1983009808   ;;  %s3282_s22 = smov (!%p242_p3, %s2363_s22), 1  ;;  %v2837_v4 = vld [vmem:[%s3275_s1 + $0x10] sm:$0xff]   ;;  %vm288_vm0 = vcmask 31744   ;;  %v2840_v9 = vld [vmem:[%s3275_s1 + $0x20] sm:$0xff]  }
   0xc   : > { %v275_v2 = vunpack.c.l.s4 %v2919_v1  ;;  %s2543_s25 = sshll.u32 %s3282_s22, 2  ;;  %2627 = vmatprep.mubr.msk.bf16.mxu1 %vm288_vm0, %v2837_v4  ;;  %2639 = vmatprep.mubr.msk.bf16.mxu0 %vm288_vm0, %v2840_v9  ;;  %s2930_s17 = smov 117   ;;  %v1911_v11 = vld [vmem:[%s3276_s2 + $0x8] sm:$0xff]  ;;  %v1910_v12 = vld [vmem:[%s3276_s2] sm:$0xff]  ;;  %v2939_v13 = vmov 0   ;;  %v1912_v14 = vld [vmem:[%s3276_s2 + $0x10] sm:$0xff] }
   0xd   : > { %v278_v3 = vshrl.u32 %v277_v0, 7  ;;  %s246_s28 = scalar_lea.vmem %s3274_s0, %s2543_s25  ;;  %s2931_s18 = smov 116   ;;  %2836 = vset.pattern.permute.xlu1 %v2939_v13  ;;  %2835 = vset.pattern.permute.xlu0 %v2939_v13  ;;  %v1913_v15 = vld [vmem:[%s3276_s2 + $0x18] sm:$0xff]  ;;  %vm286_vm1 = vcmask 1039360   ;;  %vm435_vm2 = vcmask 1031168   ;;  %vm295_vm3 = vcmask 1041408  }
   0xe   : > { %v276_v5 = vunpack.c.0.s8 %v275_v2  ;;  %v2995_v7 = vld [vmem:[%s246_s28] sm:$0xf]  ;;  %s2932_s19 = smov 115   ;;  %s2933_s20 = smov 114   ;;  %v2838_v23 = vld [vmem:[%s3275_s1 + $0x18] sm:$0xff]   ;;  %vm518_vm4 = vcmask 1022976  }
   0xf   : > { %s2934_s23 = smov 113   ;;  %s2935_s24 = smov 112   ;;  %v2842_v25 = vld [vmem:[%s3275_s1 + $0x28] sm:$0xff]   ;;  %v2839_v26 = vld [vmem:[%s3275_s1] sm:$0xff]   ;;  %v365_v27 = vsel %vm295_vm3, %v2995_v7, 0  ;;  %vm601_vm5 = vcmask 1014784  }
  0x10   : > { %v279_v6 = vsub.s32 %v276_v5, %v278_v3  ;;  %s2936_s25 = smov 111   ;;  %s2937_s26 = smov 110   ;;  %v2844_v30 = vld [vmem:[%s3275_s1 + $0x40] sm:$0xff]   ;;  %v2841_v35 = vld [vmem:[%s3275_s1 + $0x8] sm:$0xff]   ;;  %vm684_vm6 = vcmask 1006592   ;;  %v2843_v38 = vld [vmem:[%s3275_s1 + $0x30] sm:$0xff]  }
  0x11   : > { %s2938_s27 = smov 109   ;;  %v2846_v37 = vld [vmem:[%s3275_s1 + $0x48] sm:$0xff]   ;;  %v2848_v42 = vld [vmem:[%s3275_s1 + $0x60] sm:$0xff]   ;;  %vm767_vm7 = vcmask 998400   ;;  %v2845_v47 = vld [vmem:[%s3275_s1 + $0x38] sm:$0xff]   ;;  %vm850_vm8 = vcmask 990208  }
  0x12   : > { %v280_v8 = vrot.slane %v2995_v7, %v279_v6  ;;  %v2850_v49 = vld [vmem:[%s3275_s1 + $0x68] sm:$0xff]   ;;  %v2847_v50 = vld [vmem:[%s3275_s1 + $0x50] sm:$0xff]   ;;  %v2852_v54 = vld [vmem:[%s3275_s1 + $0x80] sm:$0xff]   ;;  %vm933_vm9 = vcmask 982016   ;;  %vm1016_vm10 = vcmask 973824   ;;  %vm1099_vm11 = vcmask 965632  }
  0x13   : > { %v2849_v59 = vld [vmem:[%s3275_s1 + $0x58] sm:$0xff]   ;;  %v2854_v61 = vld [vmem:[%s3275_s1 + $0x88] sm:$0xff]   ;;  %v2851_v62 = vld [vmem:[%s3275_s1 + $0x70] sm:$0xff]   ;;  %vm1182_vm12 = vcmask 957440   ;;  %vm1265_vm13 = vcmask 949248   ;;  %vm1348_vm14 = vcmask 941056  }
  0x14   : > { %282 = vrot.lane.b32.xlu0 %v280_v8, %s2920_s7  ;;  %v281_v10 = vcombine.high %v280_v8, %v280_v8  ;;  %431 = vrot.lane.b32.xlu1 %v280_v8, %s2921_s8  ;;  %v2856_v2 = vld [vmem:[%s3275_s1 + $0xa0] sm:$0xff]   ;;  %v2858_v9 = vld [vmem:[%s3275_s1 + $0xa8] sm:$0xff]   ;;  %vm1431_vm15 = vcmask 932864   ;;  %s2544_s28 = sshll.u32 %s3282_s22, 5 }
  0x18   : > { %284 = vrot.lane.b32.xlu0 %v281_v10, %s2920_s7  ;;  %433 = vrot.lane.b32.xlu1 %v281_v10, %s2921_s8  ;;  %s251_s7 = scalar_lea.vmem %s3280_s6, %s2544_s28 }
  0x1c   : > { %516 = vrot.lane.b32.xlu1 %v281_v10, %s2922_s9  ;;  %514 = vrot.lane.b32.xlu0 %v280_v8, %s2922_s9 }
  0x20   : > { %599 = vrot.lane.b32.xlu1 %v281_v10, %s2923_s10  ;;  %597 = vrot.lane.b32.xlu0 %v280_v8, %s2923_s10 }
  0x24   : > { %682 = vrot.lane.b32.xlu1 %v281_v10, %s2924_s11  ;;  %680 = vrot.lane.b32.xlu0 %v280_v8, %s2924_s11 }
  0x28   : > { %765 = vrot.lane.b32.xlu1 %v281_v10, %s2925_s12  ;;  %763 = vrot.lane.b32.xlu0 %v280_v8, %s2925_s12 }
  0x2c   : > { %848 = vrot.lane.b32.xlu1 %v281_v10, %s2926_s13  ;;  %846 = vrot.lane.b32.xlu0 %v280_v8, %s2926_s13 }
  0x30   : > { %931 = vrot.lane.b32.xlu1 %v281_v10, %s2927_s14  ;;  %929 = vrot.lane.b32.xlu0 %v280_v8, %s2927_s14 }
  0x34   : > { %1014 = vrot.lane.b32.xlu1 %v281_v10, %s2928_s15  ;;  %1012 = vrot.lane.b32.xlu0 %v280_v8, %s2928_s15 }
  0x38   : > { %1097 = vrot.lane.b32.xlu1 %v281_v10, %s2929_s16  ;;  %1095 = vrot.lane.b32.xlu0 %v280_v8, %s2929_s16 }
  0x3c   : > { %1180 = vrot.lane.b32.xlu1 %v281_v10, %s2930_s17  ;;  %1178 = vrot.lane.b32.xlu0 %v280_v8, %s2930_s17 }
  0x40   : > { %1263 = vrot.lane.b32.xlu1 %v281_v10, %s2931_s18  ;;  %1261 = vrot.lane.b32.xlu0 %v280_v8, %s2931_s18 }
  0x44   : > { %1346 = vrot.lane.b32.xlu1 %v281_v10, %s2932_s19  ;;  %1344 = vrot.lane.b32.xlu0 %v280_v8, %s2932_s19 }
  0x48   : > { %1429 = vrot.lane.b32.xlu1 %v281_v10, %s2933_s20  ;;  %1427 = vrot.lane.b32.xlu0 %v280_v8, %s2933_s20 }
  0x4c   : > { %1512 = vrot.lane.b32.xlu1 %v281_v10, %s2934_s23  ;;  %1510 = vrot.lane.b32.xlu0 %v280_v8, %s2934_s23 }
  0x50   : > { %1595 = vrot.lane.b32.xlu1 %v281_v10, %s2935_s24  ;;  %1593 = vrot.lane.b32.xlu0 %v280_v8, %s2935_s24 }
  0x54   : > { %1678 = vrot.lane.b32.xlu1 %v281_v10, %s2936_s25  ;;  %1676 = vrot.lane.b32.xlu0 %v280_v8, %s2936_s25 }
  0x58   : > { %1761 = vrot.lane.b32.xlu1 %v281_v10, %s2937_s26  ;;  %1759 = vrot.lane.b32.xlu0 %v280_v8, %s2937_s26 }
  0x5c   : > { %1844 = vrot.lane.b32.xlu1 %v281_v10, %s2938_s27  ;;  %1842 = vrot.lane.b32.xlu0 %v280_v8, %s2938_s27  ;;  %v2855_v10 = vld [vmem:[%s3275_s1 + $0x90] sm:$0xff]  }
  0x60   : > { %1921 = vperm.xlu1 %2836, %v1911_v11   ;;  %1916 = vperm.xlu0 %2835, %v1910_v12  }
  0x64   : > { %1926 = vperm.xlu1 %2836, %v1912_v14   ;;  %1931 = vperm.xlu0 %2835, %v1913_v15   ;;  %v2860_v14 = vld [vmem:[%s3275_s1 + $0xc0] sm:$0xff]  }
  0x86   : > { %v283_v16 = vpop.permute.xlu0 %282  ;;  %v432_v17 = vpop.permute.xlu1 %431 }
  0x8a   : > { %v285_v18 = vpop.permute.xlu0 %284  ;;  %v434_v19 = vpop.permute.xlu1 %433 }
  0x8b   : > { %v287_v20 = vsel %vm286_vm1, %v283_v16, %v285_v18  ;;  %v436_v21 = vsel %vm435_vm2, %v432_v17, %v434_v19  ;;  %v2857_v19 = vld [vmem:[%s3275_s1 + $0x98] sm:$0xff]   ;;  %vm1514_vm1 = vcmask 924672   ;;  %vm1597_vm2 = vcmask 916480  }
  0x8c   : > { %2784 = vmatprep.subr.msk.bf16.mxu1 %vm295_vm3, %v287_v20  ;;  %v297_v22 = vsel %vm295_vm3, %v287_v20, 0  ;;  %2786 = vmatprep.subr.msk.bf16.mxu0 %vm295_vm3, %v436_v21  ;;  %v444_v24 = vsel %vm295_vm3, %v436_v21, 0  ;;  %v2862_v21 = vld [vmem:[%s3275_s1 + $0xc8] sm:$0xff]  }
  0x8d   : > { %2626 = vmatpush3.bf16.msra.mxu1 %v297_v22  ;;  %2638 = vmatpush3.bf16.msra.mxu0 %v444_v24  ;;  %v2859_v22 = vld [vmem:[%s3275_s1 + $0xb0] sm:$0xff]  }
  0x8e   : > { %2785 = vmatprep.subr.msk.bf16.mxu1 %vm295_vm3, %v2995_v7  ;;  %v517_v28 = vpop.permute.xlu1 %516  ;;  %v515_v29 = vpop.permute.xlu0 %514  ;;  %v2853_v7 = vld [vmem:[%s3275_s1 + $0x78] sm:$0xff]  }
  0x8f   : > { %v519_v31 = vsel %vm518_vm4, %v515_v29, %v517_v28  ;;  %vm1680_vm4 = vcmask 908288  }
  0x90   : > { %2628 = vmatmul.mubr.msk.bf16.vlgmr.msra.gmra.mxu1 %vm288_vm0, %v2838_v23  ;;  %2640 = vmatmul.mubr.msk.bf16.vlgmr.msra.gmra.mxu0 %vm288_vm0, %v2842_v25  ;;  %v527_v39 = vsel %vm295_vm3, %v519_v31, 0 }
  0x91   : > { %2632 = vmatpush3.bf16.msra.mxu1 %v365_v27  ;;  %2633 = vmatprep.mubr.msk.bf16.mxu1 %vm288_vm0, %v2839_v26  ;;  %v2864_v26 = vld [vmem:[%s3275_s1 + $0xe0] sm:$0xff]  }
  0x92   : > { %v600_v32 = vpop.permute.xlu1 %599  ;;  %2787 = vmatprep.subr.msk.bf16.mxu1 %vm295_vm3, %v519_v31  ;;  %v598_v33 = vpop.permute.xlu0 %597  ;;  %2651 = vmatprep.mubr.msk.bf16.mxu0 %vm288_vm0, %v2844_v30  ;;  %v2861_v31 = vld [vmem:[%s3275_s1 + $0xb8] sm:$0xff]  }
  0x93   : > { %v602_v34 = vsel %vm601_vm5, %v598_v33, %v600_v32  ;;  %v2866_v33 = vld [vmem:[%s3275_s1 + $0xe8] sm:$0xff]   ;;  %vm1763_vm5 = vcmask 900096  }
  0x94   : > { %v610_v36 = vsel %vm295_vm3, %v602_v34, 0  ;;  %2788 = vmatprep.subr.msk.bf16.mxu0 %vm295_vm3, %v602_v34  ;;  %v2863_v34 = vld [vmem:[%s3275_s1 + $0xd0] sm:$0xff]  }
  0x95   : > { %2650 = vmatpush3.bf16.msra.mxu0 %v610_v36 }
  0x96   : > { %v683_v40 = vpop.permute.xlu1 %682  ;;  %v681_v41 = vpop.permute.xlu0 %680 }
  0x97   : > { %v685_v43 = vsel %vm684_vm6, %v681_v41, %v683_v40  ;;  %vm1846_vm6 = vcmask 891904  }
  0x98   : > { %2634 = vmatmul.mubr.msk.bf16.vlgmr.msra.gmra.mxu1 %vm288_vm0, %v2841_v35  ;;  %2652 = vmatmul.mubr.msk.bf16.vlgmr.msra.gmra.mxu0 %vm288_vm0, %v2846_v37  ;;  %v693_v51 = vsel %vm295_vm3, %v685_v43, 0 }
  0x99   : > { %2644 = vmatpush3.bf16.msra.mxu1 %v527_v39  ;;  %2645 = vmatprep.mubr.msk.bf16.mxu1 %vm288_vm0, %v2843_v38  ;;  %v2868_v38 = vld [vmem:[%s3275_s1 + $0x100] sm:$0xff]  }
  0x9a   : > { %v766_v44 = vpop.permute.xlu1 %765  ;;  %2789 = vmatprep.subr.msk.bf16.mxu1 %vm295_vm3, %v685_v43  ;;  %v764_v45 = vpop.permute.xlu0 %763  ;;  %2663 = vmatprep.mubr.msk.bf16.mxu0 %vm288_vm0, %v2848_v42  ;;  %v2865_v43 = vld [vmem:[%s3275_s1 + $0xd8] sm:$0xff]  }
  0x9b   : > { %v768_v46 = vsel %vm767_vm7, %v764_v45, %v766_v44  ;;  %v2870_v45 = vld [vmem:[%s3275_s1 + $0x108] sm:$0xff]   ;;  %vm2181_vm7 = vcmask 64512  }
  0x9c   : > { %v776_v48 = vsel %vm295_vm3, %v768_v46, 0  ;;  %2790 = vmatprep.subr.msk.bf16.mxu0 %vm295_vm3, %v768_v46  ;;  %v2867_v46 = vld [vmem:[%s3275_s1 + $0xf0] sm:$0xff]  }
  0x9d   : > { %2662 = vmatpush3.bf16.msra.mxu0 %v776_v48 }
  0x9e   : > { %v849_v52 = vpop.permute.xlu1 %848  ;;  %v847_v53 = vpop.permute.xlu0 %846 }
  0x9f   : > { %v851_v55 = vsel %vm850_vm8, %v847_v53, %v849_v52  ;;  %vm2303_vm8 = vcmask 7168  }
  0xa0   : > { %2646 = vmatmul.mubr.msk.bf16.vlgmr.msra.gmra.mxu1 %vm288_vm0, %v2845_v47  ;;  %2664 = vmatmul.mubr.msk.bf16.vlgmr.msra.gmra.mxu0 %vm288_vm0, %v2850_v49  ;;  %v859_v63 = vsel %vm295_vm3, %v851_v55, 0 }
  0xa1   : > { %2656 = vmatpush3.bf16.msra.mxu1 %v693_v51  ;;  %2657 = vmatprep.mubr.msk.bf16.mxu1 %vm288_vm0, %v2847_v50  ;;  %v2872_v50 = vld [vmem:[%s3275_s1 + $0x120] sm:$0xff]  }
  0xa2   : > { %v932_v56 = vpop.permute.xlu1 %931  ;;  %2791 = vmatprep.subr.msk.bf16.mxu1 %vm295_vm3, %v851_v55  ;;  %v930_v57 = vpop.permute.xlu0 %929  ;;  %2675 = vmatprep.mubr.msk.bf16.mxu0 %vm288_vm0, %v2852_v54  ;;  %v2869_v55 = vld [vmem:[%s3275_s1 + $0xf8] sm:$0xff]  }
  0xa3   : > { %v934_v58 = vsel %vm933_vm9, %v930_v57, %v932_v56  ;;  %v2874_v57 = vld [vmem:[%s3275_s1 + $0x128] sm:$0xff]  }
  0xa4   : > { %v942_v60 = vsel %vm295_vm3, %v934_v58, 0  ;;  %2792 = vmatprep.subr.msk.bf16.mxu0 %vm295_vm3, %v934_v58  ;;  %v2871_v58 = vld [vmem:[%s3275_s1 + $0x110] sm:$0xff]  }
  0xa5   : > { %2674 = vmatpush3.bf16.msra.mxu0 %v942_v60 }
  0xa6   : > { %v1015_v0 = vpop.permute.xlu1 %1014  ;;  %v1013_v1 = vpop.permute.xlu0 %1012 }
  0xa7   : > { %v1017_v3 = vsel %vm1016_vm10, %v1013_v1, %v1015_v0  ;;  %v2875_v0 = vld [vmem:[%s3275_s1 + $0x130] sm:$0xff]  }
  0xa8   : > { %2658 = vmatmul.mubr.msk.bf16.vlgmr.msra.gmra.mxu1 %vm288_vm0, %v2849_v59  ;;  %2676 = vmatmul.mubr.msk.bf16.vlgmr.msra.gmra.mxu0 %vm288_vm0, %v2854_v61  ;;  %v1025_v11 = vsel %vm295_vm3, %v1017_v3, 0 }
  0xa9   : > { %2668 = vmatpush3.bf16.msra.mxu1 %v859_v63  ;;  %2669 = vmatprep.mubr.msk.bf16.mxu1 %vm288_vm0, %v2851_v62  ;;  %v2873_v63 = vld [vmem:[%s3275_s1 + $0x118] sm:$0xff]  }
  0xaa   : > { %v1098_v4 = vpop.permute.xlu1 %1097  ;;  %2793 = vmatprep.subr.msk.bf16.mxu1 %vm295_vm3, %v1017_v3  ;;  %v1096_v5 = vpop.permute.xlu0 %1095  ;;  %2687 = vmatprep.mubr.msk.bf16.mxu0 %vm288_vm0, %v2856_v2  ;;  %v2876_v2 = vld [vmem:[%s3275_s1 + $0x138] sm:$0xff]  }
  0xab   : > { %v1100_v6 = vsel %vm1099_vm11, %v1096_v5, %v1098_v4  ;;  %v2877_v3 = vld [vmem:[%s3279_s5 + $0x38] sm:$0xff]   ;;  %v2878_v4 = vld [vmem:[%s3279_s5 + $0x30] sm:$0xff]   ;;  %v2879_v5 = vld [vmem:[%s3279_s5 + $0x28] sm:$0xff]  }
  0xac   : > { %v1108_v8 = vsel %vm295_vm3, %v1100_v6, 0  ;;  %2794 = vmatprep.subr.msk.bf16.mxu0 %vm295_vm3, %v1100_v6  ;;  %v2880_v6 = vld [vmem:[%s3279_s5 + $0x20] sm:$0xff]  }
  0xad   : > { %2686 = vmatpush3.bf16.msra.mxu0 %v1108_v8  ;;  %v2882_v8 = vld [vmem:[%s3279_s5 + $0x10] sm:$0xff]  }
  0xae   : > { %v1181_v12 = vpop.permute.xlu1 %1180  ;;  %v1179_v13 = vpop.permute.xlu0 %1178 }
  0xaf   : > { %v1183_v15 = vsel %vm1182_vm12, %v1179_v13, %v1181_v12 }
  0xb0   : > { %2670 = vmatmul.mubr.msk.bf16.vlgmr.msra.gmra.mxu1 %vm288_vm0, %v2853_v7  ;;  %2688 = vmatmul.mubr.msk.bf16.vlgmr.msra.gmra.mxu0 %vm288_vm0, %v2858_v9  ;;  %v1191_v23 = vsel %vm295_vm3, %v1183_v15, 0  ;;  %v2881_v7 = vld [vmem:[%s3279_s5 + $0x18] sm:$0xff]   ;;  %v2883_v9 = vld [vmem:[%s3279_s5 + $0x8] sm:$0xff]  }
  0xb1   : > { %2680 = vmatpush3.bf16.msra.mxu1 %v1025_v11  ;;  %2681 = vmatprep.mubr.msk.bf16.mxu1 %vm288_vm0, %v2855_v10  ;;  %v2884_v10 = vld [vmem:[%s3279_s5] sm:$0xff]  }
  0xb2   : > { %v1264_v16 = vpop.permute.xlu1 %1263  ;;  %2795 = vmatprep.subr.msk.bf16.mxu1 %vm295_vm3, %v1183_v15  ;;  %v1262_v17 = vpop.permute.xlu0 %1261  ;;  %2699 = vmatprep.mubr.msk.bf16.mxu0 %vm288_vm0, %v2860_v14 }
  0xb3   : > { %v1266_v18 = vsel %vm1265_vm13, %v1262_v17, %v1264_v16 }
  0xb4   : > { %v1274_v20 = vsel %vm295_vm3, %v1266_v18, 0  ;;  %2796 = vmatprep.subr.msk.bf16.mxu0 %vm295_vm3, %v1266_v18 }
  0xb5   : > { %2698 = vmatpush3.bf16.msra.mxu0 %v1274_v20 }
  0xb6   : > { %v1347_v24 = vpop.permute.xlu1 %1346  ;;  %v1345_v25 = vpop.permute.xlu0 %1344 }
  0xb7   : > { %v1349_v27 = vsel %vm1348_vm14, %v1345_v25, %v1347_v24 }
  0xb8   : > { %2682 = vmatmul.mubr.msk.bf16.vlgmr.msra.gmra.mxu1 %vm288_vm0, %v2857_v19  ;;  %2700 = vmatmul.mubr.msk.bf16.vlgmr.msra.gmra.mxu0 %vm288_vm0, %v2862_v21  ;;  %v1357_v35 = vsel %vm295_vm3, %v1349_v27, 0 }
  0xb9   : > { %2692 = vmatpush3.bf16.msra.mxu1 %v1191_v23  ;;  %2693 = vmatprep.mubr.msk.bf16.mxu1 %vm288_vm0, %v2859_v22 }
  0xba   : > { %v1430_v28 = vpop.permute.xlu1 %1429  ;;  %2797 = vmatprep.subr.msk.bf16.mxu1 %vm295_vm3, %v1349_v27  ;;  %v1428_v29 = vpop.permute.xlu0 %1427  ;;  %2711 = vmatprep.mubr.msk.bf16.mxu0 %vm288_vm0, %v2864_v26 }
  0xbb   : > { %v1432_v30 = vsel %vm1431_vm15, %v1428_v29, %v1430_v28 }
  0xbc   : > { %v1440_v32 = vsel %vm295_vm3, %v1432_v30, 0  ;;  %2798 = vmatprep.subr.msk.bf16.mxu0 %vm295_vm3, %v1432_v30 }
  0xbd   : > { %2710 = vmatpush3.bf16.msra.mxu0 %v1440_v32 }
  0xbe   : > { %v1513_v36 = vpop.permute.xlu1 %1512  ;;  %v1511_v37 = vpop.permute.xlu0 %1510 }
  0xbf   : > { %v1515_v39 = vsel %vm1514_vm1, %v1511_v37, %v1513_v36 }
  0xc0   : > { %2694 = vmatmul.mubr.msk.bf16.vlgmr.msra.gmra.mxu1 %vm288_vm0, %v2861_v31  ;;  %2712 = vmatmul.mubr.msk.bf16.vlgmr.msra.gmra.mxu0 %vm288_vm0, %v2866_v33  ;;  %v1523_v47 = vsel %vm295_vm3, %v1515_v39, 0 }
  0xc1   : > { %2704 = vmatpush3.bf16.msra.mxu1 %v1357_v35  ;;  %2705 = vmatprep.mubr.msk.bf16.mxu1 %vm288_vm0, %v2863_v34 }
  0xc2   : > { %v1596_v40 = vpop.permute.xlu1 %1595  ;;  %2799 = vmatprep.subr.msk.bf16.mxu1 %vm295_vm3, %v1515_v39  ;;  %v1594_v41 = vpop.permute.xlu0 %1593  ;;  %2723 = vmatprep.mubr.msk.bf16.mxu0 %vm288_vm0, %v2868_v38 }
  0xc3   : > { %v1598_v42 = vsel %vm1597_vm2, %v1594_v41, %v1596_v40 }
  0xc4   : > { %v1606_v44 = vsel %vm295_vm3, %v1598_v42, 0  ;;  %2800 = vmatprep.subr.msk.bf16.mxu0 %vm295_vm3, %v1598_v42 }
  0xc5   : > { %2722 = vmatpush3.bf16.msra.mxu0 %v1606_v44 }
  0xc6   : > { %v1679_v48 = vpop.permute.xlu1 %1678  ;;  %v1677_v49 = vpop.permute.xlu0 %1676 }
  0xc7   : > { %v1681_v51 = vsel %vm1680_vm4, %v1677_v49, %v1679_v48 }
  0xc8   : > { %2706 = vmatmul.mubr.msk.bf16.vlgmr.msra.gmra.mxu1 %vm288_vm0, %v2865_v43  ;;  %2724 = vmatmul.mubr.msk.bf16.vlgmr.msra.gmra.mxu0 %vm288_vm0, %v2870_v45  ;;  %v1689_v59 = vsel %vm295_vm3, %v1681_v51, 0 }
  0xc9   : > { %2716 = vmatpush3.bf16.msra.mxu1 %v1523_v47  ;;  %2717 = vmatprep.mubr.msk.bf16.mxu1 %vm288_vm0, %v2867_v46 }
  0xca   : > { %v1762_v52 = vpop.permute.xlu1 %1761  ;;  %2801 = vmatprep.subr.msk.bf16.mxu1 %vm295_vm3, %v1681_v51  ;;  %v1760_v53 = vpop.permute.xlu0 %1759  ;;  %2735 = vmatprep.mubr.msk.bf16.mxu0 %vm288_vm0, %v2872_v50 }
  0xcb   : > { %v1764_v54 = vsel %vm1763_vm5, %v1760_v53, %v1762_v52 }
  0xcc   : > { %v1772_v56 = vsel %vm295_vm3, %v1764_v54, 0  ;;  %2802 = vmatprep.subr.msk.bf16.mxu0 %vm295_vm3, %v1764_v54 }
  0xcd   : > { %2734 = vmatpush3.bf16.msra.mxu0 %v1772_v56 }
  0xce   : > { %v1845_v60 = vpop.permute.xlu1 %1844  ;;  %v1843_v61 = vpop.permute.xlu0 %1842  ;;  %2745 = vmatprep.subr.bf16.mxu0 %v2877_v3 }
  0xcf   : > { %v1847_v62 = vsel %vm1846_vm6, %v1843_v61, %v1845_v60 }
  0xd0   : > { %2718 = vmatmul.mubr.msk.bf16.vlgmr.msra.gmra.mxu1 %vm288_vm0, %v2869_v55  ;;  %2736 = vmatmul.mubr.msk.bf16.vlgmr.msra.gmra.mxu0 %vm288_vm0, %v2874_v57  ;;  %v1855_v1 = vsel %vm295_vm3, %v1847_v62, 0 }
  0xd1   : > { %2728 = vmatpush3.bf16.msra.mxu1 %v1689_v59  ;;  %2729 = vmatprep.mubr.msk.bf16.mxu1 %vm288_vm0, %v2871_v58 }
  0xd2   : > { %2803 = vmatprep.subr.msk.bf16.mxu1 %vm295_vm3, %v1847_v62  ;;  %2746 = vmatpush3.bf16.msra.mxu0 %v2877_v3  ;;  %vm2094_vm3 = vcmask 261120  }
  0xd3   : > { %2747 = vmatprep.subr.bf16.mxu0 %v2878_v4 }
  0xd6   : > { %2748 = vmatpush3.bf16.msra.mxu0 %v2878_v4 }
  0xd7   : > { %2749 = vmatprep.subr.bf16.mxu0 %v2879_v5 }
  0xd8   : > { %2730 = vmatmul.mubr.msk.bf16.vlgmr.msra.gmra.mxu1 %vm288_vm0, %v2873_v63 }
  0xd9   : > { %2740 = vmatpush3.bf16.msra.mxu1 %v1855_v1  ;;  %2741 = vmatprep.mubr.msk.bf16.mxu1 %vm288_vm0, %v2875_v0 }
  0xda   : > { %2750 = vmatpush3.bf16.msra.mxu0 %v2879_v5 }
  0xdb   : > { %2751 = vmatprep.subr.bf16.mxu0 %v2880_v6 }
  0xde   : > { %2752 = vmatpush3.bf16.msra.mxu0 %v2880_v6 }
  0xdf   : > { %2753 = vmatprep.subr.bf16.mxu0 %v2881_v7 }
  0xe0   : > { %2742 = vmatmul.mubr.msk.bf16.vlgmr.msra.gmra.mxu1 %vm288_vm0, %v2876_v2  ;;  %vm2941_vm0 = vmmov 0  }
  0xe2   : > { %2754 = vmatpush3.bf16.msra.mxu0 %v2881_v7 }
  0xe3   : > { %2755 = vmatprep.subr.bf16.mxu0 %v2882_v8 }
  0xe6   : > { %2756 = vmatpush3.bf16.msra.mxu0 %v2882_v8 }
  0xe7   : > { %2757 = vmatprep.subr.bf16.mxu0 %v2883_v9 }
  0xea   : > { %2758 = vmatpush3.bf16.msra.mxu0 %v2883_v9 }
  0xeb   : > { %2759 = vmatprep.subr.bf16.mxu0 %v2884_v10 }
  0xee   : > { %2760 = vmatpush3.bf16.msra.mxu0 %v2884_v10 }
 0x150   : > { %v2629_v11 = vpop.f32.mrf.mxu1  ;;  %v2641_v12 = vpop.f32.mrf.mxu0 }
 0x152   : > { %v333_v13 = vpop.f32.mrf.mxu1  ;;  %v480_v14 = vpop.f32.mrf.mxu0 }
 0x154   : > { %v2630_v15 = vpop.f32.mrf.mxu1  ;;  %v2642_v16 = vpop.f32.mrf.mxu0 }
 0x156   : > { %v336_v17 = vpop.f32.mrf.mxu1  ;;  %v483_v18 = vpop.f32.mrf.mxu0 }
 0x158   : > { %v2635_v19 = vpop.f32.mrf.mxu1  ;;  %v2653_v20 = vpop.f32.mrf.mxu0 }
 0x159   : > { %v410_v39 = vadd.f32 %v2635_v19, %v2629_v11 }
 0x15a   : > { %v401_v21 = vpop.f32.mrf.mxu1  ;;  %v646_v22 = vpop.f32.mrf.mxu0 }
 0x15b   : > { %v402_v42 = vadd.f32 %v401_v21, %v333_v13  ;;  %v497_v45 = vadd.f32 %v2641_v12, %v410_v39 }
 0x15c   : > { %v2636_v23 = vpop.f32.mrf.mxu1  ;;  %v2654_v24 = vpop.f32.mrf.mxu0 }
 0x15d   : > { %v413_v46 = vadd.f32 %v2636_v23, %v2630_v15  ;;  %v495_v49 = vadd.f32 %v480_v14, %v402_v42 }
 0x15e   : > { %v404_v25 = vpop.f32.mrf.mxu1  ;;  %v649_v26 = vpop.f32.mrf.mxu0 }
 0x15f   : > { %v405_v50 = vadd.f32 %v404_v25, %v336_v17  ;;  %v498_v54 = vadd.f32 %v2642_v16, %v413_v46 }
 0x160   : > { %v2647_v27 = vpop.f32.mrf.mxu1  ;;  %v2665_v28 = vpop.f32.mrf.mxu0 }
 0x161   : > { %v580_v51 = vadd.f32 %v2647_v27, %v497_v45  ;;  %v496_v58 = vadd.f32 %v483_v18, %v405_v50 }
 0x162   : > { %v563_v29 = vpop.f32.mrf.mxu1  ;;  %v812_v30 = vpop.f32.mrf.mxu0 }
 0x163   : > { %v578_v55 = vadd.f32 %v563_v29, %v495_v49  ;;  %v663_v59 = vadd.f32 %v2653_v20, %v580_v51 }
 0x164   : > { %v2648_v31 = vpop.f32.mrf.mxu1  ;;  %v2666_v32 = vpop.f32.mrf.mxu0 }
 0x165   : > { %v581_v60 = vadd.f32 %v2648_v31, %v498_v54  ;;  %v661_v63 = vadd.f32 %v646_v22, %v578_v55 }
 0x166   : > { %v566_v33 = vpop.f32.mrf.mxu1  ;;  %v815_v34 = vpop.f32.mrf.mxu0 }
 0x167   : > { %v579_v0 = vadd.f32 %v566_v33, %v496_v58  ;;  %v664_v4 = vadd.f32 %v2654_v24, %v581_v60 }
 0x168   : > { %v2659_v35 = vpop.f32.mrf.mxu1  ;;  %v2677_v36 = vpop.f32.mrf.mxu0 }
 0x169   : > { %v746_v1 = vadd.f32 %v2659_v35, %v663_v59  ;;  %v662_v8 = vadd.f32 %v649_v26, %v579_v0 }
 0x16a   : > { %v729_v37 = vpop.f32.mrf.mxu1  ;;  %v978_v38 = vpop.f32.mrf.mxu0 }
 0x16b   : > { %v744_v5 = vadd.f32 %v729_v37, %v661_v63  ;;  %v829_v9 = vadd.f32 %v2665_v28, %v746_v1 }
 0x16c   : > { %v2660_v40 = vpop.f32.mrf.mxu1  ;;  %v2678_v41 = vpop.f32.mrf.mxu0 }
 0x16d   : > { %v747_v10 = vadd.f32 %v2660_v40, %v664_v4  ;;  %v827_v13 = vadd.f32 %v812_v30, %v744_v5 }
 0x16e   : > { %v732_v43 = vpop.f32.mrf.mxu1  ;;  %v981_v44 = vpop.f32.mrf.mxu0 }
 0x16f   : > { %v745_v14 = vadd.f32 %v732_v43, %v662_v8  ;;  %v830_v18 = vadd.f32 %v2666_v32, %v747_v10 }
 0x170   : > { %v2671_v47 = vpop.f32.mrf.mxu1  ;;  %v2689_v48 = vpop.f32.mrf.mxu0 }
 0x171   : > { %v912_v15 = vadd.f32 %v2671_v47, %v829_v9  ;;  %v828_v22 = vadd.f32 %v815_v34, %v745_v14  ;;  %v1922_v14 = vpop.permute.xlu1 %1921 }
 0x172   : > { %v895_v52 = vpop.f32.mrf.mxu1  ;;  %v1144_v53 = vpop.f32.mrf.mxu0 }
 0x173   : > { %v910_v19 = vadd.f32 %v895_v52, %v827_v13  ;;  %v995_v23 = vadd.f32 %v2677_v36, %v912_v15 }
 0x174   : > { %v2672_v56 = vpop.f32.mrf.mxu1  ;;  %v2690_v57 = vpop.f32.mrf.mxu0 }
 0x175   : > { %v913_v24 = vadd.f32 %v2672_v56, %v830_v18  ;;  %v993_v29 = vadd.f32 %v978_v38, %v910_v19 }
 0x176   : > { %v898_v61 = vpop.f32.mrf.mxu1  ;;  %v1147_v62 = vpop.f32.mrf.mxu0 }
 0x177   : > { %v911_v26 = vadd.f32 %v898_v61, %v828_v22  ;;  %v996_v35 = vadd.f32 %v2678_v41, %v913_v24  ;;  %v1917_v22 = vpop.permute.xlu0 %1916 }
 0x178   : > { %v2683_v2 = vpop.f32.mrf.mxu1  ;;  %v2701_v3 = vpop.f32.mrf.mxu0 }
 0x179   : > { %v1078_v28 = vadd.f32 %v2683_v2, %v995_v23  ;;  %v994_v40 = vadd.f32 %v981_v44, %v911_v26 }
 0x17a   : > { %v1061_v6 = vpop.f32.mrf.mxu1  ;;  %v1310_v7 = vpop.f32.mrf.mxu0 }
 0x17b   : > { %v1076_v30 = vadd.f32 %v1061_v6, %v993_v29  ;;  %v1161_v42 = vadd.f32 %v2689_v48, %v1078_v28  ;;  %v1927_v29 = vpop.permute.xlu1 %1926 }
 0x17c   : > { %v2684_v11 = vpop.f32.mrf.mxu1  ;;  %v2702_v12 = vpop.f32.mrf.mxu0 }
 0x17d   : > { %v1079_v32 = vadd.f32 %v2684_v11, %v996_v35  ;;  %v1159_v46 = vadd.f32 %v1144_v53, %v1076_v30 }
 0x17e   : > { %v1064_v16 = vpop.f32.mrf.mxu1  ;;  %v1313_v17 = vpop.f32.mrf.mxu0 }
 0x17f   : > { %v1077_v34 = vadd.f32 %v1064_v16, %v994_v40  ;;  %v1162_v49 = vadd.f32 %v2690_v57, %v1079_v32 }
 0x180   : > { %v2695_v20 = vpop.f32.mrf.mxu1  ;;  %v2713_v21 = vpop.f32.mrf.mxu0 }
 0x181   : > { %v1244_v36 = vadd.f32 %v2695_v20, %v1161_v42  ;;  %v1160_v52 = vadd.f32 %v1147_v62, %v1077_v34  ;;  %v1932_v42 = vpop.permute.xlu0 %1931 }
 0x182   : > { %v1227_v25 = vpop.f32.mrf.mxu1  ;;  %v1476_v27 = vpop.f32.mrf.mxu0 }
 0x183   : > { %v1242_v50 = vadd.f32 %v1227_v25, %v1159_v46  ;;  %v1327_v54 = vadd.f32 %v2701_v3, %v1244_v36 }
 0x184   : > { %v2696_v31 = vpop.f32.mrf.mxu1  ;;  %v2714_v33 = vpop.f32.mrf.mxu0 }
 0x185   : > { %v1245_v55 = vadd.f32 %v2696_v31, %v1162_v49  ;;  %v1325_v56 = vadd.f32 %v1310_v7, %v1242_v50 }
 0x186   : > { %v1230_v37 = vpop.f32.mrf.mxu1  ;;  %v1479_v39 = vpop.f32.mrf.mxu0 }
 0x187   : > { %v1243_v58 = vadd.f32 %v1230_v37, %v1160_v52  ;;  %v1328_v60 = vadd.f32 %v2702_v12, %v1245_v55 }
 0x188   : > { %v2707_v43 = vpop.f32.mrf.mxu1  ;;  %v2725_v45 = vpop.f32.mrf.mxu0 }
 0x189   : > { %v1410_v59 = vadd.f32 %v2707_v43, %v1327_v54  ;;  %v1326_v53 = vadd.f32 %v1313_v17, %v1243_v58 }
 0x18a   : > { %v1393_v47 = vpop.f32.mrf.mxu1  ;;  %v1642_v51 = vpop.f32.mrf.mxu0 }
 0x18b   : > { %v1408_v61 = vadd.f32 %v1393_v47, %v1325_v56  ;;  %v1493_v0 = vadd.f32 %v2713_v21, %v1410_v59 }
 0x18c   : > { %v2708_v38 = vpop.f32.mrf.mxu1  ;;  %v2726_v48 = vpop.f32.mrf.mxu0 }
 0x18d   : > { %v1411_v1 = vadd.f32 %v2708_v38, %v1328_v60  ;;  %v1491_v4 = vadd.f32 %v1476_v27, %v1408_v61 }
 0x18e   : > { %v1396_v41 = vpop.f32.mrf.mxu1  ;;  %v1645_v57 = vpop.f32.mrf.mxu0 }
 0x18f   : > { %v1409_v5 = vadd.f32 %v1396_v41, %v1326_v53  ;;  %v1494_v3 = vadd.f32 %v2714_v33, %v1411_v1 }
 0x190   : > { %v2719_v44 = vpop.f32.mrf.mxu1  ;;  %v2737_v7 = vpop.f32.mrf.mxu0 }
 0x191   : > { %v1576_v6 = vadd.f32 %v2719_v44, %v1493_v0  ;;  %v1492_v10 = vadd.f32 %v1479_v39, %v1409_v5 }
 0x192   : > { %v1559_v63 = vpop.f32.mrf.mxu1  ;;  %v1808_v18 = vpop.f32.mrf.mxu0 }
 0x193   : > { %v1574_v8 = vadd.f32 %v1559_v63, %v1491_v4  ;;  %v1659_v11 = vadd.f32 %v2725_v45, %v1576_v6 }
 0x194   : > { %v2720_v2 = vpop.f32.mrf.mxu1  ;;  %v2738_v26 = vpop.f32.mrf.mxu0 }
 0x195   : > { %v1577_v13 = vadd.f32 %v2720_v2, %v1494_v3  ;;  %v1657_v15 = vadd.f32 %v1642_v51, %v1574_v8 }
 0x196   : > { %v1562_v62 = vpop.f32.mrf.mxu1  ;;  %v1811_v32 = vpop.f32.mrf.mxu0 }
 0x197   : > { %v1575_v16 = vadd.f32 %v1562_v62, %v1492_v10  ;;  %v1660_v20 = vadd.f32 %v2726_v48, %v1577_v13 }
 0x198   : > { %v2731_v9 = vpop.f32.mrf.mxu1 }
 0x199   : > { %v1742_v17 = vadd.f32 %v2731_v9, %v1659_v11  ;;  %v1658_v24 = vadd.f32 %v1645_v57, %v1575_v16 }
 0x19a   : > { %v1725_v12 = vpop.f32.mrf.mxu1 }
 0x19b   : > { %v1740_v21 = vadd.f32 %v1725_v12, %v1657_v15  ;;  %v1825_v25 = vadd.f32 %v2737_v7, %v1742_v17 }
 0x19c   : > { %v2732_v19 = vpop.f32.mrf.mxu1 }
 0x19d   : > { %v1743_v27 = vadd.f32 %v2732_v19, %v1660_v20  ;;  %v1823_v31 = vadd.f32 %v1808_v18, %v1740_v21  ;;  %v2940_v21 = vmov 0.0  }
 0x19e   : > { %v1728_v23 = vpop.f32.mrf.mxu1  ;;  %2765 = vmatprep.subr.mxu1 %v2940_v21  ;;  %2773 = vmatprep.mubr.msk.f32.mxu1 %vm2941_vm0, %v2940_v21 }
 0x19f   : > { %v1741_v33 = vadd.f32 %v1728_v23, %v1658_v24  ;;  %v1826_v37 = vadd.f32 %v2738_v26, %v1743_v27 }
 0x1a0   : > { %v2743_v28 = vpop.f32.mrf.mxu1 }
 0x1a1   : > { %v1908_v35 = vadd.f32 %v2743_v28, %v1825_v25  ;;  %v1824_v45 = vadd.f32 %v1811_v32, %v1741_v33  ;;  %v2177_v33 = vld [vmem:[%s3278_s4] sm:$0xff] }
 0x1a2   : > { %v1891_v30 = vpop.f32.mrf.mxu1 }
 0x1a3   : > { %v1936_v39 = vadd.f32 %v1927_v29, %v1908_v35  ;;  %v1906_v40 = vadd.f32 %v1891_v30, %v1823_v31  ;;  %v2093_v31 = vld [vmem:[%s3277_s3] sm:$0xff] }
 0x1a4   : > { %v2744_v43 = vpop.f32.mrf.mxu1 }
 0x1a5   : > { %v1944_v46 = vmul.f32 0.044715, %v1936_v39  ;;  %v1934_v34 = vadd.f32 %v1917_v22, %v1906_v40  ;;  %v1909_v36 = vadd.f32 %v2744_v43, %v1826_v37  ;;  %v1940_v12 = vmul.f32 0.5, %v1936_v39 }
 0x1a6   : > { %v1894_v47 = vpop.f32.mrf.mxu1 }
 0x1a7   : > { %v1948_v49 = vmul.f32 %v1944_v46, %v1936_v39  ;;  %v1942_v50 = vmul.f32 0.044715, %v1934_v34  ;;  %v1937_v38 = vadd.f32 %v1932_v42, %v1909_v36  ;;  %v1907_v51 = vadd.f32 %v1894_v47, %v1824_v45  ;;  %v2178_v36 = vld [vmem:[%s3278_s4 + $0x8] sm:$0xff]  ;;  %v2179_v47 = vld [vmem:[%s3278_s4 + $0x10] sm:$0xff] }
 0x1a8   : > { %v1938_v11 = vmul.f32 0.5, %v1934_v34 }
 0x1a9   : > { %v1952_v52 = vmul.f32 %v1948_v49, %v1936_v39  ;;  %v1946_v54 = vmul.f32 %v1942_v50, %v1934_v34  ;;  %v1945_v55 = vmul.f32 0.044715, %v1937_v38  ;;  %v1935_v41 = vadd.f32 %v1922_v14, %v1907_v51  ;;  %v2180_v49 = vld [vmem:[%s3278_s4 + $0x18] sm:$0xff] }
 0x1aa   : > { %v1941_v7 = vmul.f32 0.5, %v1937_v38 }
 0x1ab   : > { %v1956_v56 = vadd.f32 %v1952_v52, %v1936_v39  ;;  %v1949_v58 = vmul.f32 %v1945_v55, %v1937_v38  ;;  %v1943_v59 = vmul.f32 0.044715, %v1935_v41  ;;  %v1950_v44 = vmul.f32 %v1946_v54, %v1934_v34 }
 0x1ac   : > { %v1939_v13 = vmul.f32 0.5, %v1935_v41 }
 0x1ad   : > { %v1960_v48 = vmul.f32 0.7978846, %v1956_v56  ;;  %v1953_v60 = vmul.f32 %v1949_v58, %v1937_v38  ;;  %v1947_v61 = vmul.f32 %v1943_v59, %v1935_v41  ;;  %v1954_v63 = vadd.f32 %v1950_v44, %v1934_v34 }
 0x1af   : > { %v1957_v53 = vadd.f32 %v1953_v60, %v1937_v38  ;;  %v1951_v0 = vmul.f32 %v1947_v61, %v1935_v41  ;;  %v1958_v1 = vmul.f32 0.7978846, %v1954_v63  ;;  %2885 = vtanh.f32 %v1960_v48 }
 0x1b1   : > { %v1961_v2 = vmul.f32 0.7978846, %v1957_v53  ;;  %v1955_v57 = vadd.f32 %v1951_v0, %v1935_v41  ;;  %2887 = vtanh.f32 %v1958_v1 }
 0x1b3   : > { %2889 = vtanh.f32 %v1961_v2  ;;  %v1959_v4 = vmul.f32 0.7978846, %v1955_v57 }
 0x1b5   : > { %2891 = vtanh.f32 %v1959_v4 }
 0x1bc   : > { %v2886_v5 = vpop.eup %2885 }
 0x1bd   : > { %v1968_v10 = vadd.f32 1.0, %v2886_v5 }
 0x1be   : > { %v2888_v6 = vpop.eup %2887 }
 0x1bf   : > { %v1966_v3 = vadd.f32 1.0, %v2888_v6  ;;  %v1972_v18 = vmul.f32 %v1968_v10, %v1940_v12 }
 0x1c0   : > { %v2890_v62 = vpop.eup %2889 }
 0x1c1   : > { %v1969_v8 = vadd.f32 1.0, %v2890_v62  ;;  %v1970_v16 = vmul.f32 %v1966_v3, %v1938_v11 }
 0x1c2   : > { %v2892_v9 = vpop.eup %2891 }
 0x1c3   : > { %v1967_v14 = vadd.f32 1.0, %v2892_v9  ;;  %v1973_v15 = vmul.f32 %v1969_v8, %v1941_v7 }
 0x1c5   : > { %v1971_v17 = vmul.f32 %v1967_v14, %v1939_v13  ;;  %v1975_v20 = vpack.c.bf16 %v1973_v15, %v1972_v18 }
 0x1c7   : > { %v1974_v19 = vpack.c.bf16 %v1971_v17, %v1970_v16 }
 0x1c9   : > { %2761 = vmatprep.mubr.bf16.mxu0 %v1974_v19 }
 0x1ca   : > { %2762 = vmatmul.mubr.bf16.vlgmr.msra.gmra.mxu0 %v1975_v20 }
 0x28a   : > { %v2763_v22 = vpop.f32.mrf.mxu0 }
 0x28b   : > { %v3234_v29 = vmul.f32 0.05882353, %v2763_v22 }
 0x28c   : > { %v2074_v23 = vpop.f32.mrf.mxu0 }
 0x28d   : > { %v3240_v28 = vmul.f32 0.05882353, %v2074_v23 }
 0x28e   : > { %v2764_v24 = vpop.f32.mrf.mxu0 }
 0x28f   : > { %v3232_v25 = vmul.f32 0.05882353, %v2764_v24 }
 0x290   : > { %v2077_v27 = vpop.f32.mrf.mxu0 }
 0x291   : > { %2766 = vmatpush3.msra.mxu1 %v3232_v25  ;;  %v3237_v26 = vmul.f32 0.05882353, %v2077_v27 }
 0x292   : > { %2767 = vmatprep.subr.mxu1 %v2940_v21 }
 0x293   : > { %2768 = vmatpush3.msra.mxu1 %v3234_v29 }
 0x294   : > { %2769 = vmatprep.subr.mxu1 %v2940_v21 }
 0x295   : > { %2770 = vmatpush3.msra.mxu1 %v3237_v26 }
 0x296   : > { %2771 = vmatprep.subr.mxu1 %v2940_v21 }
 0x297   : > { %2772 = vmatpush3.msra.mxu1 %v3240_v28 }
 0x298   : > { %2774 = vmatmul.mubr.msk.f32.vlgmr.msra.gmra.mxu1 %vm2094_vm3, %v2093_v31 }
 0x299   : > { %2778 = vmatprep.mubr.msk.f32.mxu1 %vm2181_vm7, %v2177_v33 }
 0x358   : > { %v2164_v35 = vpop.f32.mrf.mxu1 }
 0x359   : > { %v2169_v30 = vmul.f32 0.044715, %v2164_v35  ;;  %v2168_v45 = vmul.f32 0.5, %v2164_v35 }
 0x35a   : > { %v2775_v37 = vpop.f32.mrf.mxu1 }
 0x35b   : > { %v2170_v39 = vmul.f32 %v2169_v30, %v2164_v35 }
 0x35d   : > { %v2171_v40 = vmul.f32 %v2170_v39, %v2164_v35 }
 0x35f   : > { %v2172_v42 = vadd.f32 %v2171_v40, %v2164_v35 }
 0x361   : > { %v2173_v32 = vmul.f32 0.7978846, %v2172_v42 }
 0x363   : > { %2893 = vtanh.f32 %v2173_v32 }
 0x370   : > { %v2894_v43 = vpop.eup %2893 }
 0x371   : > { %v2175_v46 = vadd.f32 1.0, %v2894_v43 }
 0x373   : > { %v2176_v34 = vmul.f32 %v2175_v46, %v2168_v45 }
 0x375   : > { %2776 = vmatprep.subr.mxu1 %v2176_v34 }
 0x376   : > { %2777 = vmatpush3.msra.mxu1 %v2176_v34 }
 0x377   : > { %2779 = vmatmul.mubr.msk.f32.vlgmr.msra.gmra.mxu1 %vm2181_vm7, %v2178_v36 }
 0x378   : > { %2781 = vmatprep.mubr.msk.f32.mxu1 %vm2181_vm7, %v2179_v47 }
 0x37b   : > { %2782 = vmatmul.mubr.msk.f32.gmra.mxu1 %vm2181_vm7, %v2180_v49 }
 0x437   : > { %v2780_v50 = vpop.f32.mrf.mxu1 }
 0x438   : > { %v2280_v38 = vsub.f32 0.0, %v2780_v50 }
 0x439   : > { %v2260_v51 = vpop.f32.mrf.mxu1 }
 0x43a   : > { %v2285_v52 = vmul.f32 1.442695, %v2280_v38  ;;  %v2279_v54 = vsub.f32 0.0, %v2260_v51 }
 0x43b   : > { %v2783_v55 = vpop.f32.mrf.mxu1 }
 0x43c   : > { %2895 = vpow2.f32 %v2285_v52  ;;  %v2283_v41 = vmul.f32 1.442695, %v2279_v54  ;;  %v2282_v56 = vsub.f32 0.0, %v2783_v55 }
 0x43d   : > { %v2270_v58 = vpop.f32.mrf.mxu1 }
 0x43e   : > { %2897 = vpow2.f32 %v2283_v41  ;;  %v2289_v59 = vmul.f32 1.442695, %v2282_v56  ;;  %v2281_v44 = vsub.f32 0.0, %v2270_v58 }
 0x440   : > { %2899 = vpow2.f32 %v2289_v59  ;;  %v2287_v48 = vmul.f32 1.442695, %v2281_v44 }
 0x442   : > { %2901 = vpow2.f32 %v2287_v48 }
 0x449   : > { %v2896_v60 = vpop.eup %2895 }
 0x44a   : > { %v2292_v61 = vadd.f32 1.0, %v2896_v60 }
 0x44b   : > { %v2898_v63 = vpop.eup %2897 }
 0x44c   : > { %2903 = vrcp.f32 %v2292_v61  ;;  %v2291_v53 = vadd.f32 1.0, %v2898_v63 }
 0x44d   : > { %v2900_v0 = vpop.eup %2899 }
 0x44e   : > { %2905 = vrcp.f32 %v2291_v53  ;;  %v2294_v1 = vadd.f32 1.0, %v2900_v0 }
 0x44f   : > { %v2902_v2 = vpop.eup %2901 }
 0x450   : > { %2907 = vrcp.f32 %v2294_v1  ;;  %v2293_v57 = vadd.f32 1.0, %v2902_v2 }
 0x452   : > { %2909 = vrcp.f32 %v2293_v57 }
 0x459   : > { %v2904_v4 = vpop.eup %2903 }
 0x45a   : > { %v2300_v5 = vmul.f32 %v2904_v4, %v3237_v26 }
 0x45b   : > { %v2906_v6 = vpop.eup %2905 }
 0x45c   : > { %2305 = vst.msk [vmem:[%s251_s7 + $0x8] sm:$0xff] %vm2303_vm8, %v2300_v5  ;;  %v2299_v62 = vmul.f32 %v2906_v6, %v3240_v28 }
 0x45d   : > { %v2908_v3 = vpop.eup %2907 }
 0x45e   : > { %2304 = vst.msk [vmem:[%s251_s7] sm:$0xff] %vm2303_vm8, %v2299_v62  ;;  %v2302_v8 = vmul.f32 %v2908_v3, %v3232_v25 }
 0x45f   : > { %v2910_v9 = vpop.eup %2909 }
 0x460   : > { %2307 = vst.msk [vmem:[%s251_s7 + $0x18] sm:$0xff] %vm2303_vm8, %v2302_v8  ;;  %v2301_v7 = vmul.f32 %v2910_v9, %v3234_v29 }
 0x462   : > { %2306 = vst.msk [vmem:[%s251_s7 + $0x10] sm:$0xff] %vm2303_vm8, %v2301_v7 }
 0x463 PF: > { %s16_s21 = sadd.s32 1, %s2917_s21  }
 0x464   : > { %p13_p4 = scmp.ge.s32.totalorder %s16_s21, 4  }
 0x466   :  { %15 = sbr.rel (!%p13_p4) target bundleno = 1 (0x1), region = 93 }

</bundles_post_ra>
